<compile_context>
chip_gen: v7x
topology: tpu7x:2x2x1
jax: 0.10.0
libtpu: 0.0.40
codegen_flags: <defaults>
</compile_context>

<pallas_src>
import functools

import jax
import jax.numpy as jnp
from jax.experimental import pallas as pl
from jax.experimental.pallas import tpu as pltpu

EMBED = 32          # self-attention embed dim (= pre_classification output)
NUM_CLASSES = 7
VMEM_LIMIT = 32 * 1024 * 1024   # explicit scoped-VMEM limit; safe on v5e/v6e/v7x


# ---------------------------------------------------------------------------
# Pallas kernel 1: M/N/K-tiled matmul, f32 scratch accumulator, fused
# bias + optional ReLU epilogue, bf16 store on the last K step.
# ---------------------------------------------------------------------------
def _mm_bias_act_kernel(x_ref, w_ref, b_ref, o_ref, acc_ref, *, relu):
    @pl.when(pl.program_id(2) == 0)
    def _():
        acc_ref[...] = jnp.zeros_like(acc_ref)

    acc_ref[...] += jnp.dot(x_ref[...], w_ref[...],
                            preferred_element_type=jnp.float32)

    @pl.when(pl.program_id(2) == pl.num_programs(2) - 1)
    def _():
        y = acc_ref[...] + b_ref[...]          # epilogue math stays f32 (v5e)
        if relu:
            y = jnp.maximum(y, 0.0)
        o_ref[...] = y.astype(o_ref.dtype)


def _pick_tile(dim, max_tile, align):
    """Largest tile <= max_tile that is a multiple of `align` and divides dim,
    or the full extent when dim already fits / nothing divides."""
    if dim <= max_tile:
        return dim
    t = (max_tile // align) * align
    while t >= align:
        if dim % t == 0:
            return t
        t -= align
    return dim


def matmul_bias_act(x, w, b, *, relu, out_dtype=jnp.bfloat16,
                    tm_max=256, tn_max=128, tk_max=4096):
    M, K = x.shape
    K2, N = w.shape
    assert K == K2
    tm = _pick_tile(M, tm_max, 8)      # sublane dim: multiple of 8 or full
    tn = _pick_tile(N, tn_max, 128)    # tn_max=128 -> >=2 parallel N blocks (v7x megacore)
    tk = _pick_tile(K, tk_max, 128)
    grid = (M // tm, N // tn, K // tk)
    bytes_accessed = (M * K * x.dtype.itemsize + K * N * w.dtype.itemsize
                      + M * N * jnp.dtype(out_dtype).itemsize + N * 4)
    return pl.pallas_call(
        functools.partial(_mm_bias_act_kernel, relu=relu),
        out_shape=jax.ShapeDtypeStruct((M, N), out_dtype),
        grid_spec=pltpu.PrefetchScalarGridSpec(
            num_scalar_prefetch=0,
            grid=grid,
            in_specs=[pl.BlockSpec((tm, tk), lambda i, j, k: (i, k)),
                      pl.BlockSpec((tk, tn), lambda i, j, k: (k, j)),
                      pl.BlockSpec((1, tn), lambda i, j, k: (0, j))],
            out_specs=pl.BlockSpec((tm, tn), lambda i, j, k: (i, j)),
            scratch_shapes=[pltpu.VMEM((tm, tn), jnp.float32)]),
        compiler_params=pltpu.CompilerParams(
            dimension_semantics=("parallel", "parallel", "arbitrary"),
            vmem_limit_bytes=VMEM_LIMIT),
        cost_estimate=pl.CostEstimate(flops=2 * M * N * K, transcendentals=0,
                                      bytes_accessed=bytes_accessed),
    )(x, w, b.reshape(1, N).astype(jnp.float32))


# ---------------------------------------------------------------------------
# NHWC im2col for stride == kernel (all convs here are non-overlapping).
# Patch layout is (kh, kw, C), matching the HWIO-flattened weight layout.
# ---------------------------------------------------------------------------
def im2col_nonoverlap_nhwc(x, k, stride, pad):
    assert stride == k
    B, H, W, C = x.shape
    if pad:
        x = jnp.pad(x, ((0, 0), (pad, pad), (pad, pad), (0, 0)))
    Hp, Wp = H + 2 * pad, W + 2 * pad
    oh = (Hp - k) // stride + 1
    ow = (Wp - k) // stride + 1
    if oh == 1 and ow == 1 and Hp == k and Wp == k:
        return x.reshape(B, k * k * C), 1, 1     # pure reshape, no transpose
    x = x[:, :oh * k, :ow * k, :]
    x = x.reshape(B, oh, k, ow, k, C)
    # TODO(synk): for large feature maps, express this gather through a
    # BlockSpec index_map instead of an XLA transpose.
    patches = x.transpose(0, 1, 3, 2, 4, 5).reshape(B * oh * ow, k * k * C)
    return patches, oh, ow


def conv2d_nhwc(x, w_mat, b, k, stride, pad, *, relu=True):
    B = x.shape[0]
    patches, oh, ow = im2col_nonoverlap_nhwc(x, k, stride, pad)
    if patches.dtype != jnp.bfloat16:
        patches = patches.astype(jnp.bfloat16)
    y = matmul_bias_act(patches, w_mat, b, relu=relu)
    return y.reshape(B, oh, ow, -1)                    # stays NHWC, bf16


# ---------------------------------------------------------------------------
# Shared head math (traced inside both the fused-tail and the fallback head
# kernels).  x: (B, 256) f32.  Returns a lane-dense (B, 128) f32 logits slab.
# vec_ref rows: 0 pe1_b | 1 k2 | 2 pe3_b | 3 gap_const | 4 fc1_b | 5 bn_g
#               6 bn_b | 7 bn_rm | 8 bn_rv | 9 bq | 10 bk | 11 bv | 12 bo
#               13 bc (padded to 128)
# ---------------------------------------------------------------------------
def _head_math(x, wfc_ref, wqkv_ref, wo_ref, wc_ref, vec_ref):
    E = EMBED
    fc1_b = vec_ref[4:5, :E]
    g, be = vec_ref[5:6, :E], vec_ref[6:7, :E]
    rm, rv = vec_ref[7:8, :E], vec_ref[8:9, :E]
    bq, bk, bv = vec_ref[9:10, :E], vec_ref[10:11, :E], vec_ref[11:12, :E]
    bo = vec_ref[12:13, :E]
    bc = vec_ref[13:14, :128]
    # dropout(0.5): inference mode -> identity
    h = jnp.dot(x.astype(jnp.bfloat16), wfc_ref[...],
                preferred_element_type=jnp.float32) + fc1_b
    h = jnp.maximum(h, 0.0)
    h = (h - rm) * jax.lax.rsqrt(rv + 1e-5) * g + be
    # single-head self attention over the BATCH axis (PyTorch batch_first=False
    # + unsqueeze(1): sequence length == batch, batch == 1)
    qkv = jnp.dot(h.astype(jnp.bfloat16), wqkv_ref[...],
                  preferred_element_type=jnp.float32)          # (B, 128) lane-dense
    q = qkv[:, :E] + bq
    k = qkv[:, E:2 * E] + bk
    v = qkv[:, 2 * E:3 * E] + bv
    s = jax.lax.dot_general(q, k, (((1,), (1,)), ((), ())),
                            preferred_element_type=jnp.float32)
    s = s * (1.0 / jnp.sqrt(jnp.float32(E)))
    s = s - jnp.max(s, axis=-1, keepdims=True)
    e = jnp.exp(s)
    attn = e / jnp.sum(e, axis=-1, keepdims=True)
    a = jnp.dot(attn, v, preferred_element_type=jnp.float32)
    o = jnp.dot(a.astype(jnp.bfloat16), wo_ref[...],
                preferred_element_type=jnp.float32) + bo
    # dropout: identity; classification head -> padded 128-lane slab
    return jnp.dot(o.astype(jnp.bfloat16), wc_ref[...],
                   preferred_element_type=jnp.float32) + bc


# ---------------------------------------------------------------------------
# Pallas kernel 2: fully fused post-backbone tail for a 1x1 backbone feature.
# pe1 zero-skip: with pad=16 on a 1x1 map only output (4,4) sees data, through
# kernel tap (0,0); all other positions are relu(pe1_b).  Consequently only
# pe2 output (2,2) is data-dependent (tap (0,0) = center, other taps = the
# constant border), and the GAP over the pe3 map is y22_3/16 + const.
# ---------------------------------------------------------------------------
def _fused_tail_kernel(f_ref, w1_ref, w2_ref, w3_ref, wfc_ref, wqkv_ref,
                       wo_ref, wc_ref, vec_ref, out_ref):
    b_pe1 = vec_ref[0:1, :]
    k2 = vec_ref[1:2, :]          # border1 @ (pe2 taps 01+10+11) + pe2_b
    b_pe3 = vec_ref[2:3, :]
    gap_c = vec_ref[3:4, :]       # 15/16 * relu(relu(border1@pe2_sum + b2)@W3 + b3)
    center = jnp.maximum(
        jnp.dot(f_ref[...], w1_ref[...], preferred_element_type=jnp.float32)
        + b_pe1, 0.0)                                            # (B, 256) pe1(4,4)
    y = jnp.maximum(
        jnp.dot(center.astype(jnp.bfloat16), w2_ref[...],
                preferred_element_type=jnp.float32) + k2, 0.0)   # pe2(2,2)
    y = jnp.maximum(
        jnp.dot(y.astype(jnp.bfloat16), w3_ref[...],
                preferred_element_type=jnp.float32) + b_pe3, 0.0)  # pe3(2,2)
    gap = y * (1.0 / 16.0) + gap_c                               # GAP over 4x4
    out_ref[...] = _head_math(gap, wfc_ref, wqkv_ref, wo_ref, wc_ref, vec_ref)


def fused_tail(f, p, num_classes):
    B = f.shape[0]
    vmem = pl.BlockSpec(memory_space=pltpu.MemorySpace.VMEM)
    args = (f, p['pe1_w00'], p['pe2_w00'], p['pe3_wm'], p['fc1_w'],
            p['wqkv'], p['wo'], p['wc'], p['vecs'])
    out = pl.pallas_call(
        _fused_tail_kernel,
        out_shape=jax.ShapeDtypeStruct((B, 128), jnp.float32),
        in_specs=[vmem] * len(args),
        out_specs=vmem,
        compiler_params=pltpu.CompilerParams(vmem_limit_bytes=VMEM_LIMIT),
    )(*args)
    return out[:, :num_classes]


# ---------------------------------------------------------------------------
# Fallback head kernel (general backbone output): GAP + head in one call.
# ---------------------------------------------------------------------------
def _head_kernel(feat_ref, wfc_ref, wqkv_ref, wo_ref, wc_ref, vec_ref, out_ref):
    gap = jnp.mean(feat_ref[...].astype(jnp.float32), axis=1)   # (B, 256)
    out_ref[...] = _head_math(gap, wfc_ref, wqkv_ref, wo_ref, wc_ref, vec_ref)


def head(feat, p, num_classes):
    B = feat.shape[0]
    vmem = pl.BlockSpec(memory_space=pltpu.MemorySpace.VMEM)
    args = (feat, p['fc1_w'], p['wqkv'], p['wo'], p['wc'], p['vecs'])
    out = pl.pallas_call(
        _head_kernel,
        out_shape=jax.ShapeDtypeStruct((B, 128), jnp.float32),
        in_specs=[vmem] * len(args),
        out_specs=vmem,
        compiler_params=pltpu.CompilerParams(vmem_limit_bytes=VMEM_LIMIT),
    )(*args)
    return out[:, :num_classes]


# ---------------------------------------------------------------------------
# parameters (deterministic synthetic init, shapes from the module __init__)
# ---------------------------------------------------------------------------
def init_params(key, num_classes):
    ks = jax.random.split(key, 16)

    def conv_w(k, oc, ic, kh, kw):
        w = jax.random.normal(k, (oc, ic, kh, kw), jnp.float32) / jnp.sqrt(ic * kh * kw)
        # HWIO-flattened matmul layout matching the NHWC im2col (kh,kw,ic) order
        return w.transpose(2, 3, 1, 0).reshape(kh * kw * ic, oc)

    def pad_to(v, n):
        return jnp.pad(v, (0, n - v.shape[0]))

    relu = lambda v: jnp.maximum(v, 0.0)

    p = {}
    # TODO(synk): frozen pretrained MobileNetV2 backbone cannot be loaded;
    # replaced by a deterministic stand-in strided conv 3->1280, k=16, s=16
    # reproducing the backbone's /16 downsample and 1280-ch feature map.
    p['bb_w'] = conv_w(ks[0], 1280, 3, 16, 16).astype(jnp.bfloat16)
    p['bb_b'] = jnp.zeros((1280,), jnp.float32)
    # patch_extraction (full f32 mats kept for the general fallback path)
    pe1_w = conv_w(ks[1], 256, 1280, 4, 4)
    pe1_b = 0.01 * jax.random.normal(ks[2], (256,), jnp.float32)
    pe2_w = conv_w(ks[3], 256, 256, 2, 2)
    pe2_b = 0.01 * jax.random.normal(ks[4], (256,), jnp.float32)
    pe3_w = conv_w(ks[5], 256, 256, 1, 1)
    pe3_b = 0.01 * jax.random.normal(ks[6], (256,), jnp.float32)
    p['pe1_w'], p['pe1_b'] = pe1_w.astype(jnp.bfloat16), pe1_b
    p['pe2_w'], p['pe2_b'] = pe2_w.astype(jnp.bfloat16), pe2_b
    p['pe3_w'], p['pe3_b'] = pe3_w.astype(jnp.bfloat16), pe3_b
    # fused-path constants (only valid when the backbone output is 1x1 spatial)
    border1 = relu(pe1_b)                                   # pe1 output off-center
    w2_00 = pe2_w[:256]                                     # pe2 tap (0,0)
    w2_rest = pe2_w[256:512] + pe2_w[512:768] + pe2_w[768:1024]
    k2 = border1 @ w2_rest + pe2_b                          # data-independent part of pe2(2,2)
    c2 = relu(border1 @ (w2_00 + w2_rest) + pe2_b)          # pe2 output at 15 border positions
    c3 = relu(c2 @ pe3_w + pe3_b)                           # pe3 output at border positions
    gap_const = (15.0 / 16.0) * c3
    p['pe1_w00'] = pe1_w[:1280].astype(jnp.bfloat16)        # (1280, 256): pe1 tap (0,0)
    p['pe2_w00'] = w2_00.astype(jnp.bfloat16)               # (256, 256)
    p['pe3_wm'] = pe3_w.astype(jnp.bfloat16)                # (256, 256)
    # pre_classification: Linear(256,32) + BatchNorm1d(32) (eval stats)
    fc1_w = (jax.random.normal(ks[7], (32, 256), jnp.float32) / jnp.sqrt(256.0)).T
    fc1_b = 0.01 * jax.random.normal(ks[8], (32,), jnp.float32)
    bn_g, bn_b = jnp.ones((32,), jnp.float32), jnp.zeros((32,), jnp.float32)
    bn_rm, bn_rv = jnp.zeros((32,), jnp.float32), jnp.ones((32,), jnp.float32)
    # MultiheadAttention(embed=32, heads=1): in_proj (96,32), out_proj (32,32)
    in_w = jax.random.normal(ks[9], (3 * EMBED, EMBED), jnp.float32) / jnp.sqrt(32.0)
    in_b = 0.01 * jax.random.normal(ks[10], (3 * EMBED,), jnp.float32)
    wq, wk, wv = in_w[:EMBED].T, in_w[EMBED:2 * EMBED].T, in_w[2 * EMBED:].T
    bq, bk, bv = in_b[:EMBED], in_b[EMBED:2 * EMBED], in_b[2 * EMBED:]
    wqkv = jnp.concatenate([wq, wk, wv], axis=1)                   # (32, 96)
    wqkv = jnp.pad(wqkv, ((0, 0), (0, 128 - 3 * EMBED)))           # lane-dense 128
    wo = (jax.random.normal(ks[11], (EMBED, EMBED), jnp.float32) / jnp.sqrt(32.0)).T
    bo = jnp.zeros((EMBED,), jnp.float32)
    # classification_head: Linear(32, num_classes), padded to 128 lanes
    wc = (jax.random.normal(ks[12], (num_classes, EMBED), jnp.float32) / jnp.sqrt(32.0)).T
    bc = 0.01 * jax.random.normal(ks[13], (num_classes,), jnp.float32)
    wc = jnp.pad(wc, ((0, 0), (0, 128 - num_classes)))
    p['fc1_w'] = fc1_w.astype(jnp.bfloat16)
    p['wqkv'] = wqkv.astype(jnp.bfloat16)
    p['wo'] = wo.astype(jnp.bfloat16)
    p['wc'] = wc.astype(jnp.bfloat16)
    # all small vectors / constants packed into one (14, 256) f32 ref -> 1 DMA
    p['vecs'] = jnp.stack([
        pe1_b, k2, pe3_b, gap_const,
        pad_to(fc1_b, 256), pad_to(bn_g, 256), pad_to(bn_b, 256),
        pad_to(bn_rm, 256), pad_to(bn_rv, 256),
        pad_to(bq, 256), pad_to(bk, 256), pad_to(bv, 256), pad_to(bo, 256),
        pad_to(bc, 256),
    ])
    return p


# ---------------------------------------------------------------------------
# forward pass (NHWC internally; input is NCHW to match PyTorch)
# ---------------------------------------------------------------------------
def forward(x, params, num_classes=NUM_CLASSES):
    B = x.shape[0]
    x = x.transpose(0, 2, 3, 1)                                 # NCHW -> NHWC once
    # backbone stand-in (see TODO(synk) in init_params): one tiled MXU matmul
    patches, oh, ow = im2col_nonoverlap_nhwc(x, 16, 16, 0)
    f = matmul_bias_act(patches.astype(jnp.bfloat16), params['bb_w'],
                        params['bb_b'], relu=True)              # (B*oh*ow, 1280) bf16
    if oh == 1 and ow == 1:
        # fast path: everything after the backbone fused into one kernel
        return fused_tail(f, params, num_classes)
    # general fallback path (backbone output not 1x1 spatial)
    f = f.reshape(B, oh, ow, 1280)
    f = conv2d_nhwc(f, params['pe1_w'], params['pe1_b'], 4, 4, 16, relu=True)
    f = conv2d_nhwc(f, params['pe2_w'], params['pe2_b'], 2, 2, 0, relu=True)
    f = conv2d_nhwc(f, params['pe3_w'], params['pe3_b'], 1, 1, 0, relu=True)
    feat = f.reshape(B, -1, 256)           # channels already last: no transpose
    return head(feat, params, num_classes)


if __name__ == "__main__":
    key = jax.random.PRNGKey(0)
    k_param, k_x = jax.random.split(key)
    params = init_params(k_param, NUM_CLASSES)
    x = jax.random.normal(k_x, (2, 3, 16, 16), jnp.float32)     # small NCHW input

    fwd = jax.jit(forward)
    logits = jax.block_until_ready(fwd(x, params))
    assert logits.shape == (2, NUM_CLASSES)
    assert bool(jnp.all(jnp.isfinite(logits)))
    print("KERNEL_OK")
</pallas_src>

<mosaic_0001>
module attributes {stable_mosaic.version = 11 : i64} {
  func.func @_mm_bias_act_kernel(%arg0: i32, %arg1: i32, %arg2: i32, %arg3: memref<2x768xbf16, #tpu.memory_space<vmem>>, %arg4: memref<768x128xbf16, #tpu.memory_space<vmem>>, %arg5: memref<1x128xf32, #tpu.memory_space<vmem>>, %arg6: memref<2x128xbf16, #tpu.memory_space<vmem>>, %arg7: memref<2x128xf32, #tpu.memory_space<vmem>>) attributes {dimension_semantics = [#tpu.dimension_semantics<parallel>, #tpu.dimension_semantics<parallel>, #tpu.dimension_semantics<arbitrary>], iteration_bounds = array<i64: 1, 10, 1>, scalar_prefetch = 0 : i64, scratch_operands = 1 : i64, tpu.core_type = #tpu.core_type<tc>, window_params = [{transform_indices = @transform_0, window_bounds = array<i64: 2, 768>}, {transform_indices = @transform_1, window_bounds = array<i64: 768, 128>}, {transform_indices = @transform_2, window_bounds = array<i64: 1, 128>}, {transform_indices = @transform_3, window_bounds = array<i64: 2, 128>}]} {
    %c0_i32 = arith.constant 0 : i32
    %0 = arith.cmpi eq, %arg2, %c0_i32 : i32
    %1 = arith.extui %0 : i1 to i32
    %c0_i32_0 = arith.constant 0 : i32
    %2 = arith.cmpi ne, %1, %c0_i32_0 : i32
    scf.if %2 {
      %cst_10 = arith.constant 0.000000e+00 : f32
      %12 = vector.broadcast %cst_10 : f32 to vector<2x128xf32>
      %c0_11 = arith.constant 0 : index
      %c0_12 = arith.constant 0 : index
      %13 = vector.load %arg7[%c0_11, %c0_12] : memref<2x128xf32, #tpu.memory_space<vmem>>, vector<2x128xf32>
      tpu.vector_store %arg7[%c0_11, %c0_12], %12 {strides = array<i32>} : memref<2x128xf32, #tpu.memory_space<vmem>>, vector<2x128xf32>,
    } else {
    }
    %c0 = arith.constant 0 : index
    %c0_1 = arith.constant 0 : index
    %3 = vector.load %arg7[%c0, %c0_1] : memref<2x128xf32, #tpu.memory_space<vmem>>, vector<2x128xf32>
    %c0_2 = arith.constant 0 : index
    %c0_3 = arith.constant 0 : index
    %4 = vector.load %arg3[%c0_2, %c0_3] : memref<2x768xbf16, #tpu.memory_space<vmem>>, vector<2x768xbf16>
    %c0_4 = arith.constant 0 : index
    %c0_5 = arith.constant 0 : index
    %5 = vector.load %arg4[%c0_4, %c0_5] : memref<768x128xbf16, #tpu.memory_space<vmem>>, vector<768x128xbf16>
    %cst = arith.constant dense<0.000000e+00> : vector<2x128xf32>
    %6 = tpu.matmul %4, %5, %cst {dimension_numbers = #tpu.dot_dimension_numbers<[1], [0], [0], [1], [0, 0, 1, 1], [], []>} : vector<2x768xbf16>, vector<768x128xbf16>, vector<2x128xf32> -> vector<2x128xf32>
    %7 = arith.addf %3, %6 : vector<2x128xf32>
    %c0_6 = arith.constant 0 : index
    %c0_7 = arith.constant 0 : index
    %8 = vector.load %arg7[%c0_6, %c0_7] : memref<2x128xf32, #tpu.memory_space<vmem>>, vector<2x128xf32>
    tpu.vector_store %arg7[%c0_6, %c0_7], %7 {strides = array<i32>} : memref<2x128xf32, #tpu.memory_space<vmem>>, vector<2x128xf32>,
    %c0_i32_8 = arith.constant 0 : i32
    %9 = arith.cmpi eq, %arg2, %c0_i32_8 : i32
    %10 = arith.extui %9 : i1 to i32
    %c0_i32_9 = arith.constant 0 : i32
    %11 = arith.cmpi ne, %10, %c0_i32_9 : i32
    scf.if %11 {
      %c0_10 = arith.constant 0 : index
      %c0_11 = arith.constant 0 : index
      %12 = vector.load %arg7[%c0_10, %c0_11] : memref<2x128xf32, #tpu.memory_space<vmem>>, vector<2x128xf32>
      %c0_12 = arith.constant 0 : index
      %c0_13 = arith.constant 0 : index
      %13 = vector.load %arg5[%c0_12, %c0_13] : memref<1x128xf32, #tpu.memory_space<vmem>>, vector<1x128xf32>
      %14 = vector.broadcast %13 : vector<1x128xf32> to vector<2x128xf32>
      %15 = arith.addf %12, %14 : vector<2x128xf32>
      %cst_14 = arith.constant 0.000000e+00 : f32
      %16 = vector.broadcast %cst_14 : f32 to vector<2x128xf32>
      %17 = arith.maximumf %15, %16 : vector<2x128xf32>
      %18 = arith.truncf %17 : vector<2x128xf32> to vector<2x128xbf16>
      %c0_15 = arith.constant 0 : index
      %c0_16 = arith.constant 0 : index
      %19 = vector.load %arg6[%c0_15, %c0_16] : memref<2x128xbf16, #tpu.memory_space<vmem>>, vector<2x128xbf16>
      tpu.vector_store %arg6[%c0_15, %c0_16], %18 {strides = array<i32>} : memref<2x128xbf16, #tpu.memory_space<vmem>>, vector<2x128xbf16>,
    } else {
    }
    return
  }
  func.func @transform_0(%arg0: i32, %arg1: i32, %arg2: i32) -> (i32, i32) {
    %c0_i32 = arith.constant 0 : i32
    return %arg0, %arg2 : i32, i32
  }
  func.func @transform_1(%arg0: i32, %arg1: i32, %arg2: i32) -> (i32, i32) {
    %c0_i32 = arith.constant 0 : i32
    return %arg2, %arg1 : i32, i32
  }
  func.func @transform_2(%arg0: i32, %arg1: i32, %arg2: i32) -> (i32, i32) {
    %c0_i32 = arith.constant 0 : i32
    %c0_i32_0 = arith.constant 0 : i32
    return %c0_i32, %arg1 : i32, i32
  }
  func.func @transform_3(%arg0: i32, %arg1: i32, %arg2: i32) -> (i32, i32) {
    %c0_i32 = arith.constant 0 : i32
    return %arg0, %arg1 : i32, i32
  }
}

module attributes {stable_mosaic.version = 11 : i64} {
  func.func @_fused_tail_kernel(%arg0: memref<2x1280xbf16, #tpu.memory_space<vmem>>, %arg1: memref<1280x256xbf16, #tpu.memory_space<vmem>>, %arg2: memref<256x256xbf16, #tpu.memory_space<vmem>>, %arg3: memref<256x256xbf16, #tpu.memory_space<vmem>>, %arg4: memref<256x32xbf16, #tpu.memory_space<vmem>>, %arg5: memref<32x128xbf16, #tpu.memory_space<vmem>>, %arg6: memref<32x32xbf16, #tpu.memory_space<vmem>>, %arg7: memref<32x128xbf16, #tpu.memory_space<vmem>>, %arg8: memref<14x256xf32, #tpu.memory_space<vmem>>, %arg9: memref<2x128xf32, #tpu.memory_space<vmem>>) attributes {dimension_semantics = [], scalar_prefetch = 0 : i64, scratch_operands = 0 : i64, tpu.core_type = #tpu.core_type<tc>} {
    %c0 = arith.constant 0 : index
    %c0_0 = arith.constant 0 : index
    %0 = vector.load %arg8[%c0, %c0_0] : memref<14x256xf32, #tpu.memory_space<vmem>>, vector<1x256xf32>
    %c1 = arith.constant 1 : index
    %c0_1 = arith.constant 0 : index
    %1 = vector.load %arg8[%c1, %c0_1] : memref<14x256xf32, #tpu.memory_space<vmem>>, vector<1x256xf32>
    %c2 = arith.constant 2 : index
    %c0_2 = arith.constant 0 : index
    %2 = vector.load %arg8[%c2, %c0_2] : memref<14x256xf32, #tpu.memory_space<vmem>>, vector<1x256xf32>
    %c3 = arith.constant 3 : index
    %c0_3 = arith.constant 0 : index
    %3 = vector.load %arg8[%c3, %c0_3] : memref<14x256xf32, #tpu.memory_space<vmem>>, vector<1x256xf32>
    %c0_4 = arith.constant 0 : index
    %c0_5 = arith.constant 0 : index
    %4 = vector.load %arg0[%c0_4, %c0_5] : memref<2x1280xbf16, #tpu.memory_space<vmem>>, vector<2x1280xbf16>
    %c0_6 = arith.constant 0 : index
    %c0_7 = arith.constant 0 : index
    %5 = vector.load %arg1[%c0_6, %c0_7] : memref<1280x256xbf16, #tpu.memory_space<vmem>>, vector<1280x256xbf16>
    %cst = arith.constant dense<0.000000e+00> : vector<2x256xf32>
    %6 = tpu.matmul %4, %5, %cst {dimension_numbers = #tpu.dot_dimension_numbers<[1], [0], [0], [1], [0, 0, 1, 1], [], []>} : vector<2x1280xbf16>, vector<1280x256xbf16>, vector<2x256xf32> -> vector<2x256xf32>
    %7 = vector.broadcast %0 : vector<1x256xf32> to vector<2x256xf32>
    %8 = arith.addf %6, %7 : vector<2x256xf32>
    %cst_8 = arith.constant 0.000000e+00 : f32
    %9 = vector.broadcast %cst_8 : f32 to vector<2x256xf32>
    %10 = arith.maximumf %8, %9 : vector<2x256xf32>
    %11 = arith.truncf %10 : vector<2x256xf32> to vector<2x256xbf16>
    %c0_9 = arith.constant 0 : index
    %c0_10 = arith.constant 0 : index
    %12 = vector.load %arg2[%c0_9, %c0_10] : memref<256x256xbf16, #tpu.memory_space<vmem>>, vector<256x256xbf16>
    %cst_11 = arith.constant dense<0.000000e+00> : vector<2x256xf32>
    %13 = tpu.matmul %11, %12, %cst_11 {dimension_numbers = #tpu.dot_dimension_numbers<[1], [0], [0], [1], [0, 0, 1, 1], [], []>} : vector<2x256xbf16>, vector<256x256xbf16>, vector<2x256xf32> -> vector<2x256xf32>
    %14 = vector.broadcast %1 : vector<1x256xf32> to vector<2x256xf32>
    %15 = arith.addf %13, %14 : vector<2x256xf32>
    %cst_12 = arith.constant 0.000000e+00 : f32
    %16 = vector.broadcast %cst_12 : f32 to vector<2x256xf32>
    %17 = arith.maximumf %15, %16 : vector<2x256xf32>
    %18 = arith.truncf %17 : vector<2x256xf32> to vector<2x256xbf16>
    %c0_13 = arith.constant 0 : index
    %c0_14 = arith.constant 0 : index
    %19 = vector.load %arg3[%c0_13, %c0_14] : memref<256x256xbf16, #tpu.memory_space<vmem>>, vector<256x256xbf16>
    %cst_15 = arith.constant dense<0.000000e+00> : vector<2x256xf32>
    %20 = tpu.matmul %18, %19, %cst_15 {dimension_numbers = #tpu.dot_dimension_numbers<[1], [0], [0], [1], [0, 0, 1, 1], [], []>} : vector<2x256xbf16>, vector<256x256xbf16>, vector<2x256xf32> -> vector<2x256xf32>
    %21 = vector.broadcast %2 : vector<1x256xf32> to vector<2x256xf32>
    %22 = arith.addf %20, %21 : vector<2x256xf32>
    %cst_16 = arith.constant 0.000000e+00 : f32
    %23 = vector.broadcast %cst_16 : f32 to vector<2x256xf32>
    %24 = arith.maximumf %22, %23 : vector<2x256xf32>
    %cst_17 = arith.constant 6.250000e-02 : f32
    %25 = vector.broadcast %cst_17 : f32 to vector<2x256xf32>
    %26 = arith.mulf %24, %25 : vector<2x256xf32>
    %27 = vector.broadcast %3 : vector<1x256xf32> to vector<2x256xf32>
    %28 = arith.addf %26, %27 : vector<2x256xf32>
    %c4 = arith.constant 4 : index
    %c0_18 = arith.constant 0 : index
    %29 = vector.load %arg8[%c4, %c0_18] : memref<14x256xf32, #tpu.memory_space<vmem>>, vector<1x32xf32>
    %c5 = arith.constant 5 : index
    %c0_19 = arith.constant 0 : index
    %30 = vector.load %arg8[%c5, %c0_19] : memref<14x256xf32, #tpu.memory_space<vmem>>, vector<1x32xf32>
    %c6 = arith.constant 6 : index
    %c0_20 = arith.constant 0 : index
    %31 = vector.load %arg8[%c6, %c0_20] : memref<14x256xf32, #tpu.memory_space<vmem>>, vector<1x32xf32>
    %c7 = arith.constant 7 : index
    %c0_21 = arith.constant 0 : index
    %32 = vector.load %arg8[%c7, %c0_21] : memref<14x256xf32, #tpu.memory_space<vmem>>, vector<1x32xf32>
    %c8 = arith.constant 8 : index
    %c0_22 = arith.constant 0 : index
    %33 = vector.load %arg8[%c8, %c0_22] : memref<14x256xf32, #tpu.memory_space<vmem>>, vector<1x32xf32>
    %c9 = arith.constant 9 : index
    %c0_23 = arith.constant 0 : index
    %34 = vector.load %arg8[%c9, %c0_23] : memref<14x256xf32, #tpu.memory_space<vmem>>, vector<1x32xf32>
    %c10 = arith.constant 10 : index
    %c0_24 = arith.constant 0 : index
    %35 = vector.load %arg8[%c10, %c0_24] : memref<14x256xf32, #tpu.memory_space<vmem>>, vector<1x32xf32>
    %c11 = arith.constant 11 : index
    %c0_25 = arith.constant 0 : index
    %36 = vector.load %arg8[%c11, %c0_25] : memref<14x256xf32, #tpu.memory_space<vmem>>, vector<1x32xf32>
    %c12 = arith.constant 12 : index
    %c0_26 = arith.constant 0 : index
    %37 = vector.load %arg8[%c12, %c0_26] : memref<14x256xf32, #tpu.memory_space<vmem>>, vector<1x32xf32>
    %c13 = arith.constant 13 : index
    %c0_27 = arith.constant 0 : index
    %38 = vector.load %arg8[%c13, %c0_27] : memref<14x256xf32, #tpu.memory_space<vmem>>, vector<1x128xf32>
    %39 = arith.truncf %28 : vector<2x256xf32> to vector<2x256xbf16>
    %c0_28 = arith.constant 0 : index
    %c0_29 = arith.constant 0 : index
    %40 = vector.load %arg4[%c0_28, %c0_29] : memref<256x32xbf16, #tpu.memory_space<vmem>>, vector<256x32xbf16>
    %cst_30 = arith.constant dense<0.000000e+00> : vector<2x32xf32>
    %41 = tpu.matmul %39, %40, %cst_30 {dimension_numbers = #tpu.dot_dimension_numbers<[1], [0], [0], [1], [0, 0, 1, 1], [], []>} : vector<2x256xbf16>, vector<256x32xbf16>, vector<2x32xf32> -> vector<2x32xf32>
    %42 = vector.broadcast %29 : vector<1x32xf32> to vector<2x32xf32>
    %43 = arith.addf %41, %42 : vector<2x32xf32>
    %cst_31 = arith.constant 0.000000e+00 : f32
    %44 = vector.broadcast %cst_31 : f32 to vector<2x32xf32>
    %45 = arith.maximumf %43, %44 : vector<2x32xf32>
    %46 = vector.broadcast %32 : vector<1x32xf32> to vector<2x32xf32>
    %47 = arith.subf %45, %46 : vector<2x32xf32>
    %cst_32 = arith.constant 9.99999974E-6 : f32
    %48 = vector.broadcast %cst_32 : f32 to vector<1x32xf32>
    %49 = arith.addf %33, %48 : vector<1x32xf32>
    %50 = math.rsqrt %49 : vector<1x32xf32>
    %51 = vector.broadcast %50 : vector<1x32xf32> to vector<2x32xf32>
    %52 = arith.mulf %47, %51 : vector<2x32xf32>
    %53 = vector.broadcast %30 : vector<1x32xf32> to vector<2x32xf32>
    %54 = arith.mulf %52, %53 : vector<2x32xf32>
    %55 = vector.broadcast %31 : vector<1x32xf32> to vector<2x32xf32>
    %56 = arith.addf %54, %55 : vector<2x32xf32>
    %57 = arith.truncf %56 : vector<2x32xf32> to vector<2x32xbf16>
    %c0_33 = arith.constant 0 : index
    %c0_34 = arith.constant 0 : index
    %58 = vector.load %arg5[%c0_33, %c0_34] : memref<32x128xbf16, #tpu.memory_space<vmem>>, vector<32x128xbf16>
    %cst_35 = arith.constant dense<0.000000e+00> : vector<2x128xf32>
    %59 = tpu.matmul %57, %58, %cst_35 {dimension_numbers = #tpu.dot_dimension_numbers<[1], [0], [0], [1], [0, 0, 1, 1], [], []>} : vector<2x32xbf16>, vector<32x128xbf16>, vector<2x128xf32> -> vector<2x128xf32>
    %60 = vector.extract_strided_slice %59 {offsets = [0, 0], sizes = [2, 32], strides = [1, 1]} : vector<2x128xf32> to vector<2x32xf32>
    %61 = vector.broadcast %34 : vector<1x32xf32> to vector<2x32xf32>
    %62 = arith.addf %60, %61 : vector<2x32xf32>
    %63 = vector.extract_strided_slice %59 {offsets = [0, 32], sizes = [2, 32], strides = [1, 1]} : vector<2x128xf32> to vector<2x32xf32>
    %64 = vector.broadcast %35 : vector<1x32xf32> to vector<2x32xf32>
    %65 = arith.addf %63, %64 : vector<2x32xf32>
    %66 = vector.extract_strided_slice %59 {offsets = [0, 64], sizes = [2, 32], strides = [1, 1]} : vector<2x128xf32> to vector<2x32xf32>
    %67 = vector.broadcast %36 : vector<1x32xf32> to vector<2x32xf32>
    %68 = arith.addf %66, %67 : vector<2x32xf32>
    %cst_36 = arith.constant dense<0.000000e+00> : vector<2x2xf32>
    %69 = tpu.matmul %62, %65, %cst_36 {dimension_numbers = #tpu.dot_dimension_numbers<[1], [1], [0], [0], [0, 0, 1, 0], [], []>} : vector<2x32xf32>, vector<2x32xf32>, vector<2x2xf32> -> vector<2x2xf32>
    %cst_37 = arith.constant 3.200000e+01 : f32
    %70 = math.sqrt %cst_37 : f32
    %cst_38 = arith.constant 1.000000e+00 : f32
    %71 = arith.divf %cst_38, %70 : f32
    %72 = vector.broadcast %71 : f32 to vector<2x2xf32>
    %73 = arith.mulf %69, %72 : vector<2x2xf32>
    %cst_39 = arith.constant dense<0xFF800000> : vector<2xf32>
    %74 = vector.multi_reduction <maximumf>, %73, %cst_39 [1] : vector<2x2xf32> to vector<2xf32>
    %75 = vector.shape_cast %74 : vector<2xf32> to vector<2x1xf32>
    %76 = vector.broadcast %75 : vector<2x1xf32> to vector<2x2xf32>
    %77 = arith.subf %73, %76 : vector<2x2xf32>
    %78 = math.exp %77 : vector<2x2xf32>
    %cst_40 = arith.constant dense<0.000000e+00> : vector<2xf32>
    %79 = vector.multi_reduction <add>, %78, %cst_40 [1] : vector<2x2xf32> to vector<2xf32>
    %80 = vector.shape_cast %79 : vector<2xf32> to vector<2x1xf32>
    %81 = vector.broadcast %80 : vector<2x1xf32> to vector<2x2xf32>
    %82 = arith.divf %78, %81 : vector<2x2xf32>
    %cst_41 = arith.constant dense<0.000000e+00> : vector<2x32xf32>
    %83 = tpu.matmul %82, %68, %cst_41 {dimension_numbers = #tpu.dot_dimension_numbers<[1], [0], [0], [1], [0, 0, 1, 1], [], []>} : vector<2x2xf32>, vector<2x32xf32>, vector<2x32xf32> -> vector<2x32xf32>
    %84 = arith.truncf %83 : vector<2x32xf32> to vector<2x32xbf16>
    %c0_42 = arith.constant 0 : index
    %c0_43 = arith.constant 0 : index
    %85 = vector.load %arg6[%c0_42, %c0_43] : memref<32x32xbf16, #tpu.memory_space<vmem>>, vector<32x32xbf16>
    %cst_44 = arith.constant dense<0.000000e+00> : vector<2x32xf32>
    %86 = tpu.matmul %84, %85, %cst_44 {dimension_numbers = #tpu.dot_dimension_numbers<[1], [0], [0], [1], [0, 0, 1, 1], [], []>} : vector<2x32xbf16>, vector<32x32xbf16>, vector<2x32xf32> -> vector<2x32xf32>
    %87 = vector.broadcast %37 : vector<1x32xf32> to vector<2x32xf32>
    %88 = arith.addf %86, %87 : vector<2x32xf32>
    %89 = arith.truncf %88 : vector<2x32xf32> to vector<2x32xbf16>
    %c0_45 = arith.constant 0 : index
    %c0_46 = arith.constant 0 : index
    %90 = vector.load %arg7[%c0_45, %c0_46] : memref<32x128xbf16, #tpu.memory_space<vmem>>, vector<32x128xbf16>
    %cst_47 = arith.constant dense<0.000000e+00> : vector<2x128xf32>
    %91 = tpu.matmul %89, %90, %cst_47 {dimension_numbers = #tpu.dot_dimension_numbers<[1], [0], [0], [1], [0, 0, 1, 1], [], []>} : vector<2x32xbf16>, vector<32x128xbf16>, vector<2x128xf32> -> vector<2x128xf32>
    %92 = vector.broadcast %38 : vector<1x128xf32> to vector<2x128xf32>
    %93 = arith.addf %91, %92 : vector<2x128xf32>
    %c0_48 = arith.constant 0 : index
    %c0_49 = arith.constant 0 : index
    %94 = vector.load %arg9[%c0_48, %c0_49] : memref<2x128xf32, #tpu.memory_space<vmem>>, vector<2x128xf32>
    tpu.vector_store %arg9[%c0_48, %c0_49], %93 {strides = array<i32>} : memref<2x128xf32, #tpu.memory_space<vmem>>, vector<2x128xf32>,
    return
  }
}

</mosaic_0001>

<bundles_post_ra>
// kernel: forward.2
= control target key start
LH: loop header
LB: loop body
LE: loop exit
PB: predicated region body
PF: predicated region fallthrough
CT: control target
= control target key end

     0   :  { %8 = vsyncpa [#allocation4], 0  ;;  %s1485_s0 = inlined_call_operand.vmem [shape: bf16[2,768], index: 0, kind: input, shape index: {}]   ;;  %s1486_s1 = inlined_call_operand.hbm [shape: bf16[768,1280], index: 1, kind: input, shape index: {}]   ;;  %s1487_s2 = inlined_call_operand.vmem [shape: f32[1,1280], index: 2, kind: input, shape index: {}]   ;;  %s1488_s3 = inlined_call_operand.vmem [shape: bf16[2,1280], index: 3, kind: output, shape index: {}]  }
   0x1   :  { %10 = vsyncpa [#allocation4 + $0x1], 0  ;;  %s1309_s12 = smov 0   ;;  %s1311_s13 = smov 0  }
   0x2   :  { %s1313_s14 = smov 0   ;;  %s1315_s15 = smov 0  }
   0x3   :  { %s1317_s16 = smov 0   ;;  %s1319_s17 = smov 0  }
   0x4 LB: > { %s966_s18 = sadd.s32 4294967295, %s1281_s17   ;;  %s31_s19 = sadd.s32 1, %s1277_s16  ;;  %s1281_s17 = sphi %s1319_s17, %s16_s17   ;;  %s1277_s16 = sphi %s1317_s16, %s1496_s16   ;;  %s1273_s15 = sphi %s1315_s15, %s1495_s15   ;;  %s1269_s14 = sphi %s1313_s14, %s1494_s14   ;;  %s1265_s13 = sphi %s1311_s13, %s1493_s13   ;;  %s1261_s12 = sphi %s1309_s12, %s1492_s12  }
   0x5   : > { %p33_p0 = scmp.ge.s32.totalorder %s31_s19, 10  ;;  %s72_s20 = sadd.s32 1, %s1269_s14 }
   0x6   : > { %p79_p1 = scmp.ne.s32.totalorder %s1269_s14, %s1265_s13  ;;  %p80_p2 = scmp.eq.s32.totalorder %s1281_s17, 0 }
   0x7   : > { %s1498_s19 = smov (%p33_p0, %s31_s19), 0  ;;  %p85_p4 = scmp.ne.s32.totalorder %s1265_s13, %s1261_s12 }
   0x8   : > { %p81_p3 = por %p80_p2, %p79_p1  ;;  %s68_s21 = ssub.s32 %s1277_s16, %s1498_s19 }
   0x9   : > { %p86_p5 = scmp.eq.s32.totalorder %s966_s18, 0  ;;  %p70_p6 = scmp.eq.s32.totalorder %s68_s21, 0 }
   0xa   : > { %p1098_p8 = scmp.lt.s32.totalorder %s1281_s17, 10  ;;  %s175_s24 = sand.u32 1, %s1269_s14  }
   0xb   : > { %p1348_p7 = por %p86_p5, %p85_p4  ;;  %s971_s25 = sshll.u32 %s1277_s16, 6 }
   0xc   : > { %s1354_s23 = scalar_select %p70_p6, %s1269_s14, %s72_s20  }
   0xd   : > { %s1090_s26 = smul.u32 384, %s175_s24  ;;  %s1361_s29 = scalar_lea.hbm %s1486_s1, %s971_s25 }
   0xe   : > { %p1363_p9 = pnand %p1098_p8, %p81_p3  ;;  %s1370_s6 = scalar_lea.sflag [#allocation4], %s175_s24 }
   0xf   : > { %s179_s4 = scalar_lea.vmem [#allocation3], %s1090_s26  ;;  %s1201_s7 = scalar_lea.hbm %s1361_s29, 6144 }
  0x10   : > { %s188_s5 = sshll.u32 %s179_s4, 4  ;;  %p1202_p11 = scmp.ne.s32.totalorder %s1361_s29, %s1201_s7  ;;  %s1367_s5 = int_to_ptr.vmem [resolvable:$true] %s188_s5 }
  0x11   : > { %p1203_p12 = pneg %p1363_p9  ;;  %s1206_s10 = scalar_lea.hbm %s1486_s1, 61440 }
  0x12   : > { %p1207_p1 = scmp.lt.u32.totalorder %s1361_s29, %s1486_s1  ;;  %p1208_p2 = scmp.lt.u32.totalorder %s1206_s10, %s1201_s7 }
  0x13   : > { %p1204_p13 = pnand %p1203_p12, %p1202_p11  ;;  %p1210_p4 = scmp.lt.u32.totalorder %s1201_s7, %s1361_s29 }
  0x14   : > { %p1209_p3 = por %p1208_p2, %p1207_p1 }
  0x15   : > { %p1205_p0 = pneg %p1204_p13 }
  0x16   : > { %p1211_p5 = por %p1210_p4, %p1209_p3 }
  0x18   : > { %p1212_p6 = pnand %p1211_p5, %p1205_p0 }
  0x1a   : > { %1215 = shalt.err (!%p1212_p6)
}
  0x1b   : > { %s1216_s18 = scalar_lea.vmem %s1367_s5, 6144  ;;  %s1283_s20 = smov [#allocation3]  }
  0x1c   : > { %p1217_p8 = scmp.ne.s32.totalorder %s1367_s5, %s1216_s18  ;;  %s1221_s21 = sshll.u32 %s1283_s20, 4  ;;  %s1222_s21 = int_to_ptr.vmem [resolvable:$false] %s1221_s21 }
  0x1d   : > { %s1223_s24 = scalar_lea.vmem %s1222_s21, 12288  ;;  %p1224_p10 = scmp.lt.s32.totalorder %s1367_s5, %s1222_s21 }
  0x1e   : > { %p1219_p11 = pnand %p1217_p8, %p1203_p12  ;;  %p1225_p1 = scmp.lt.s32.totalorder %s1223_s24, %s1216_s18 }
  0x20   : > { %p1220_p13 = pneg %p1219_p11  ;;  %p1226_p2 = por %p1225_p1, %p1224_p10 }
  0x22   : > { %p1227_p3 = pnand %p1226_p2, %p1220_p13 }
  0x24   : > { %1230 = shalt.err (!%p1227_p3)
}
  0x25   : > { %s1284_s25 = smov 640   ;;  %s1285_s26 = smov 64  }
  0x26   : > { %s1286_s27 = smov 4   ;;  %p202_p12 = scmp.lt.s32.totalorder %s1281_s17, 11 }
  0x27   : > { %1097 = dma.hbm_to_vmem [thread:$0]  (!%p1363_p9), %s1361_s29, 6144, %s1367_s5, %s1370_s6, %s1284_s25, %s1285_s26, %s1286_s27  }
  0x28   : > { %p1491_p0 = scmp.ge.s32.totalorder %s1281_s17, 1 }
  0x2a   : > { %p203_p4 = pnand %p1491_p0, %p202_p12 }
  0x2b   : > { %s208_s28 = sand.u32 (!%p203_p4), 1, %s1265_s13  }
  0x2c   : > { %206 = sbr.rel (%p203_p4) target bundleno = 352 (0x160), region = 32  ;;  %s209_s7 = scalar_lea.sflag (!%p203_p4), [#allocation4], %s208_s28 }
  0x2d   : > { %s1091_s4 = smul.u32 (!%p203_p4), 384, %s208_s28 }
  0x2f   : > { %s1402_s8 = scalar_lea.vmem (!%p203_p4), [#allocation3], %s1091_s4 }
  0x33   : > { %1256 = dma.done.wait (%p1348_p7), %s209_s7, 6144  }
  0x34   : > { %1258 = vsyncadd (%p1348_p7), %s209_s7, 4294961152  ;;  %v1152_v0 = vld [vmem:[%s1402_s8 + $0x40] sm:$0xff]   ;;  %v1156_v4 = vld [vmem:[%s1402_s8 + $0x48] sm:$0xff]   ;;  %v1287_v22 = vmov 1966171168   ;;  %v377_v24 = vlaneseq  ;;  %p258_p7 = scmp.lt.s32.totalorder %s1273_s15, 9 }
  0x35   : > { %v1153_v1 = vld [vmem:[%s1402_s8 + $0xc0] sm:$0xff]   ;;  %1024 = vmatprep.subr.bf16.mxu0 %v1152_v0  ;;  %v1157_v5 = vld [vmem:[%s1402_s8 + $0xc8] sm:$0xff]   ;;  %v1160_v8 = vld [vmem:[%s1402_s8 + $0x50] sm:$0xff]   ;;  %v375_v23 = vunpack.c.l.s4 %v1287_v22 }
  0x36   : > { %v1154_v2 = vld [vmem:[%s1402_s8] sm:$0xff]   ;;  %1046 = vmatprep.subr.bf16.mxu1 %v1153_v1  ;;  %v1158_v6 = vld [vmem:[%s1402_s8 + $0x8] sm:$0xff]   ;;  %v1161_v9 = vld [vmem:[%s1402_s8 + $0xd0] sm:$0xff]   ;;  %v378_v30 = vshrl.u32 %v377_v24, 7  ;;  %s1500_s15 = smov (!%p258_p7, %s1273_s15), 9 }
  0x37   : > { %v1155_v3 = vld [vmem:[%s1402_s8 + $0x80] sm:$0xff]   ;;  %1025 = vmatpush3.bf16.msra.mxu0 %v1154_v2  ;;  %v1159_v7 = vld [vmem:[%s1402_s8 + $0x88] sm:$0xff]   ;;  %v1162_v10 = vld [vmem:[%s1402_s8 + $0x10] sm:$0xff]   ;;  %v376_v29 = vunpack.c.0.s8 %v375_v23  ;;  %v1288_v2 = vmov 0.0   ;;  %s260_s6 = scalar_lea.vmem %s1487_s2, %s1500_s15  ;;  %s267_s11 = scalar_lea.vmem %s1488_s3, %s1500_s15 }
  0x38   : > { %1047 = vmatpush3.bf16.msra.mxu1 %v1155_v3  ;;  %1026 = vmatprep.subr.bf16.mxu0 %v1156_v4  ;;  %v1163_v11 = vld [vmem:[%s1402_s8 + $0x90] sm:$0xff]   ;;  %v1164_v12 = vld [vmem:[%s1402_s8 + $0x58] sm:$0xff]   ;;  %v1168_v16 = vld [vmem:[%s1402_s8 + $0x60] sm:$0xff]   ;;  %273 = vst [vmem:[#allocation2] sm:$0x3] %v1288_v2 }
  0x39   : > { %1048 = vmatprep.subr.bf16.mxu1 %v1157_v5  ;;  %v1165_v13 = vld [vmem:[%s1402_s8 + $0xd8] sm:$0xff]   ;;  %v1169_v17 = vld [vmem:[%s1402_s8 + $0xe0] sm:$0xff]   ;;  %v1172_v20 = vld [vmem:[%s1402_s8 + $0x68] sm:$0xff]   ;;  %v379_v35 = vsub.s32 %v376_v29, %v378_v30 }
  0x3a   : > { %v1166_v14 = vld [vmem:[%s1402_s8 + $0x18] sm:$0xff]   ;;  %v1170_v18 = vld [vmem:[%s1402_s8 + $0x20] sm:$0xff]   ;;  %v1173_v21 = vld [vmem:[%s1402_s8 + $0xe8] sm:$0xff]  }
  0x3b   : > { %1027 = vmatpush3.bf16.msra.mxu0 %v1158_v6  ;;  %v1167_v15 = vld [vmem:[%s1402_s8 + $0x98] sm:$0xff]   ;;  %v1171_v19 = vld [vmem:[%s1402_s8 + $0xa0] sm:$0xff]   ;;  %v1174_v25 = vld [vmem:[%s1402_s8 + $0x28] sm:$0xff]  }
  0x3c   : > { %1049 = vmatpush3.bf16.msra.mxu1 %v1159_v7  ;;  %1028 = vmatprep.subr.bf16.mxu0 %v1160_v8  ;;  %v1175_v26 = vld [vmem:[%s1402_s8 + $0xa8] sm:$0xff]   ;;  %v1176_v27 = vld [vmem:[%s1402_s8 + $0x70] sm:$0xff]   ;;  %v1180_v33 = vld [vmem:[%s1402_s8 + $0x78] sm:$0xff]  }
  0x3d   : > { %1050 = vmatprep.subr.bf16.mxu1 %v1161_v9  ;;  %v1177_v28 = vld [vmem:[%s1402_s8 + $0xf0] sm:$0xff]   ;;  %v1181_v34 = vld [vmem:[%s1402_s8 + $0xf8] sm:$0xff]   ;;  %v1185_v41 = vld [vmem:[%s1402_s8 + $0x140] sm:$0xff]  }
  0x3e   : > { %v1178_v31 = vld [vmem:[%s1402_s8 + $0x30] sm:$0xff]   ;;  %v1182_v36 = vld [vmem:[%s1402_s8 + $0x38] sm:$0xff]   ;;  %v1186_v46 = vld [vmem:[%s1402_s8 + $0x100] sm:$0xff]  }
  0x3f   : > { %1029 = vmatpush3.bf16.msra.mxu0 %v1162_v10  ;;  %v1179_v32 = vld [vmem:[%s1402_s8 + $0xb0] sm:$0xff]   ;;  %v1183_v37 = vld [vmem:[%s1402_s8 + $0xb8] sm:$0xff]   ;;  %v1187_v49 = vld [vmem:[%s1402_s8 + $0x148] sm:$0xff]  }
  0x40   : > { %1051 = vmatpush3.bf16.msra.mxu1 %v1163_v11  ;;  %1030 = vmatprep.subr.bf16.mxu0 %v1164_v12  ;;  %v275_v38 = vld [vmem:[%s1485_s0] sm:$0x3f]  ;;  %v1188_v52 = vld [vmem:[%s1402_s8 + $0x108] sm:$0xff]   ;;  %v1189_v53 = vld [vmem:[%s1402_s8 + $0x150] sm:$0xff]  }
  0x41   : > { %1052 = vmatprep.subr.bf16.mxu1 %v1165_v13  ;;  %v373_v39 = vcombine.high %v275_v38, %v275_v38  ;;  %v380_v40 = vrot.slane %v275_v38, %v379_v35  ;;  %v1190_v54 = vld [vmem:[%s1402_s8 + $0x110] sm:$0xff]   ;;  %v1191_v55 = vld [vmem:[%s1402_s8 + $0x158] sm:$0xff]   ;;  %v1193_v57 = vld [vmem:[%s1402_s8 + $0x160] sm:$0xff]  }
  0x42   : > { %v1192_v56 = vld [vmem:[%s1402_s8 + $0x118] sm:$0xff]   ;;  %v1194_v58 = vld [vmem:[%s1402_s8 + $0x120] sm:$0xff]   ;;  %v1195_v59 = vld [vmem:[%s1402_s8 + $0x168] sm:$0xff]  }
  0x43   : > { %1031 = vmatpush3.bf16.msra.mxu0 %v1166_v14  ;;  %v388_v42 = vcombine.high %v380_v40, %v380_v40  ;;  %v396_v43 = vrot.slane %v380_v40, %v379_v35  ;;  %v387_v44 = vrot.slane %v373_v39, %v379_v35  ;;  %v1196_v60 = vld [vmem:[%s1402_s8 + $0x128] sm:$0xff]   ;;  %v1197_v61 = vld [vmem:[%s1402_s8 + $0x170] sm:$0xff]   ;;  %v1199_v63 = vld [vmem:[%s1402_s8 + $0x178] sm:$0xff]  }
  0x44   : > { %1053 = vmatpush3.bf16.msra.mxu1 %v1167_v15  ;;  %1032 = vmatprep.subr.bf16.mxu0 %v1168_v16  ;;  %v1198_v62 = vld [vmem:[%s1402_s8 + $0x130] sm:$0xff]   ;;  %v1200_v0 = vld [vmem:[%s1402_s8 + $0x138] sm:$0xff]  }
  0x45   : > { %1054 = vmatprep.subr.bf16.mxu1 %v1169_v17  ;;  %v410_v45 = vrot.slane %v388_v42, %v379_v35  ;;  %v389_v47 = vcombine.high %v387_v44, %v387_v44  ;;  %v418_v48 = vcombine.high %v396_v43, %v396_v43  ;;  %v403_v1 = vrot.slane %v387_v44, %v379_v35  ;;  %v1021_v22 = vld [vmem:[%s260_s6] ss:$0 sm:$0xff] }
  0x47   : > { %1033 = vmatpush3.bf16.msra.mxu0 %v1170_v18  ;;  %746 = vmatprep.mubr.bf16.mxu0 %v410_v45  ;;  %v419_v50 = vcombine.high %v410_v45, %v410_v45  ;;  %v417_v51 = vrot.slane %v389_v47, %v379_v35  ;;  %v274_v18 = vld [vmem:[#allocation2] sm:$0x3] }
  0x48   : > { %1055 = vmatpush3.bf16.msra.mxu1 %v1171_v19  ;;  %1034 = vmatprep.subr.bf16.mxu0 %v1172_v20 }
  0x49   : > { %1056 = vmatprep.subr.bf16.mxu1 %v1173_v21  ;;  %786 = vmatprep.mubr.bf16.mxu1 %v419_v50 }
  0x4b   : > { %1035 = vmatpush3.bf16.msra.mxu0 %v1174_v25 }
  0x4c   : > { %1057 = vmatpush3.bf16.msra.mxu1 %v1175_v26  ;;  %1036 = vmatprep.subr.bf16.mxu0 %v1176_v27 }
  0x4d   : > { %1058 = vmatprep.subr.bf16.mxu1 %v1177_v28 }
  0x4f   : > { %1037 = vmatpush3.bf16.msra.mxu0 %v1178_v31 }
  0x50   : > { %1059 = vmatpush3.bf16.msra.mxu1 %v1179_v32  ;;  %1038 = vmatprep.subr.bf16.mxu0 %v1180_v33 }
  0x51   : > { %1060 = vmatprep.subr.bf16.mxu1 %v1181_v34 }
  0x53   : > { %1039 = vmatpush3.bf16.msra.mxu0 %v1182_v36 }
  0x54   : > { %1061 = vmatpush3.bf16.msra.mxu1 %v1183_v37  ;;  %1068 = vmatprep.subr.bf16.mxu0 %v1185_v41 }
  0x56   : > { %747 = vmatmul.mubr.bf16.vlgmr.msra.gmra.mrb[0].mxu0 %v396_v43 }
  0x57   : > { %1069 = vmatpush3.bf16.msra.mxu0 %v1186_v46  ;;  %787 = vmatmul.mubr.bf16.vlgmr.msra.gmra.mrb[0].mxu1 %v418_v48 }
  0x58   : > { %1070 = vmatprep.subr.bf16.mxu0 %v1187_v49  ;;  %826 = vmatprep.mubr.bf16.mxu0 %v417_v51 }
  0x5b   : > { %1071 = vmatpush3.bf16.msra.mxu0 %v1188_v52 }
  0x5c   : > { %1072 = vmatprep.subr.bf16.mxu0 %v1189_v53 }
  0x5f   : > { %1073 = vmatpush3.bf16.msra.mxu0 %v1190_v54 }
  0x60   : > { %1074 = vmatprep.subr.bf16.mxu0 %v1191_v55 }
  0x63   : > { %1075 = vmatpush3.bf16.msra.mxu0 %v1192_v56 }
  0x64   : > { %1076 = vmatprep.subr.bf16.mxu0 %v1193_v57 }
  0x67   : > { %1077 = vmatpush3.bf16.msra.mxu0 %v1194_v58 }
  0x68   : > { %1078 = vmatprep.subr.bf16.mxu0 %v1195_v59 }
  0x6b   : > { %1079 = vmatpush3.bf16.msra.mxu0 %v1196_v60 }
  0x6c   : > { %1080 = vmatprep.subr.bf16.mxu0 %v1197_v61 }
  0x6f   : > { %1081 = vmatpush3.bf16.msra.mxu0 %v1198_v62 }
  0x70   : > { %1082 = vmatprep.subr.bf16.mxu0 %v1199_v63 }
  0x73   : > { %1083 = vmatpush3.bf16.msra.mxu0 %v1200_v0 }
  0x76   : > { %827 = vmatmul.mubr.bf16.vlgmr.msra.gmra.mrb[4].mxu0 %v403_v1 }
 0x129   : > { %v1040_v3 = vpop.f32.mrb[0].mxu0 }
 0x12a   : > { %v1041_v4 = vpop.f32.mrb[1].mxu0  ;;  %v1062_v5 = vpop.f32.mrb[0].mxu1 }
 0x12b   : > { %v1042_v6 = vadd.f32 %v1041_v4, %v1040_v3  ;;  %v1043_v7 = vpop.f32.mrb[2].mxu0  ;;  %v1063_v8 = vpop.f32.mrb[1].mxu1 }
 0x12c   : > { %v1044_v9 = vpop.f32.mrb[3].mxu0  ;;  %v1064_v10 = vadd.f32 %v1063_v8, %v1062_v5  ;;  %v1065_v11 = vpop.f32.mrb[2].mxu1 }
 0x12d   : > { %v1066_v12 = vpop.f32.mrb[3].mxu1 }
 0x12e   : > { %v789_v13 = vadd.f32 %v1064_v10, %v1042_v6 }
 0x149   : > { %v1084_v14 = vpop.f32.mrb[4].mxu0 }
 0x14a   : > { %v1085_v15 = vpop.f32.mrb[5].mxu0 }
 0x14b   : > { %v1086_v16 = vadd.f32 %v1085_v15, %v1084_v14  ;;  %v1087_v17 = vpop.f32.mrb[6].mxu0 }
 0x14c   : > { %v1088_v19 = vpop.f32.mrb[7].mxu0 }
 0x14d   : > { %v829_v20 = vadd.f32 %v1086_v16, %v789_v13 }
 0x14f   : > { %v834_v21 = vadd.f32 %v829_v20, %v274_v18 }
 0x151   : > { %835 = vst [vmem:[#allocation2] sm:$0x3] %v834_v21 }
 0x158   : > { %v839_v23 = vld [vmem:[#allocation2] sm:$0x3] }
 0x159   : > { %v847_v24 = vadd.f32 %v1021_v22, %v839_v23 }
 0x15b   : > { %v848_v25 = vmax.f32 %v847_v24, 0.0 }
 0x15d   : > { %v849_v26 = vpack.c.bf16 %v848_v25, %v848_v25 }
 0x15f   : > { %850 = vst [vmem:[%s267_s11] sm:$0x1] %v849_v26 }
 0x160 PF: > { %s16_s17 = sadd.s32 1, %s1281_s17   ;;  %s1492_s12 = smov %s1265_s13 }
 0x161   : > { %p13_p9 = scmp.ge.s32.totalorder %s16_s17, 12   ;;  %s1493_s13 = smov %s1269_s14 }
 0x162   : > { %s1494_s14 = smov %s1354_s23  ;;  %s1495_s15 = smov %s1277_s16 }
 0x163   : > { %s1496_s16 = smov %s1498_s19  ;;  %15 = sbr.rel (!%p13_p9) target bundleno = 4 (0x4), region = 86 }
 0x16a   :  { %876 = vsyncpa [#allocation4], 1 }
 0x16b   :  { %878 = vsyncpa [#allocation4 + $0x1], 1 }

// kernel: forward.3
= control target key start
LH: loop header
LB: loop body
LE: loop exit
PB: predicated region body
PF: predicated region fallthrough
CT: control target
= control target key end

     0   :  { %v204_v7 = vlaneseq  ;;  %v3118_v8 = vmov 1966171168   ;;  %s4050_s0 = inlined_call_operand.vmem [shape: bf16[2,1280], index: 0, kind: input, shape index: {}]   ;;  %s4051_s1 = inlined_call_operand.vmem [shape: bf16[1280,256], index: 1, kind: input, shape index: {}]   ;;  %s4052_s2 = inlined_call_operand.vmem [shape: bf16[256,256], index: 2, kind: input, shape index: {}]   ;;  %s4053_s3 = inlined_call_operand.vmem [shape: bf16[256,256], index: 3, kind: input, shape index: {}]   ;;  %s4054_s4 = inlined_call_operand.vmem [shape: bf16[256,32], index: 4, kind: input, shape index: {}]   ;;  %s4055_s5 = inlined_call_operand.vmem [shape: bf16[32,128], index: 5, kind: input, shape index: {}]   ;;  %s4056_s6 = inlined_call_operand.vmem [shape: bf16[32,32], index: 6, kind: input, shape index: {}]   ;;  %s4057_s7 = inlined_call_operand.vmem [shape: bf16[32,128], index: 7, kind: input, shape index: {}]   ;;  %s4058_s8 = inlined_call_operand.vmem [shape: f32[14,256], index: 8, kind: input, shape index: {}]   ;;  %s4059_s9 = inlined_call_operand.hbm [shape: f32[2,128], index: 9, kind: output, shape index: {}]  }
   0x1   :  { %v2729_v0 = vld [vmem:[%s4051_s1 + $0x104] ss:$8 sps:$4 sm:$0xff]   ;;  %v2731_v1 = vld [vmem:[%s4051_s1 + $0x100] ss:$8 sps:$4 sm:$0xff]   ;;  %v2732_v2 = vld [vmem:[%s4051_s1 + $0x114] ss:$8 sps:$4 sm:$0xff]   ;;  %v218_v9 = vunpack.c.l.s4 %v3118_v8 }
   0x2   :  { %1138 = vmatprep.subr.bf16.mxu0 %v2729_v0  ;;  %v2734_v3 = vld [vmem:[%s4051_s1 + $0x110] ss:$8 sps:$4 sm:$0xff]   ;;  %v2735_v4 = vld [vmem:[%s4051_s1 + $0x124] ss:$8 sps:$4 sm:$0xff]   ;;  %v2737_v5 = vld [vmem:[%s4051_s1 + $0x120] ss:$8 sps:$4 sm:$0xff]  }
   0x3   :  { %1139 = vmatpush1.bf16.msra.mxu0 %v2731_v1  ;;  %v2738_v6 = vld [vmem:[%s4051_s1 + $0x134] ss:$8 sps:$4 sm:$0xff]   ;;  %v2740_v10 = vld [vmem:[%s4051_s1 + $0x130] ss:$8 sps:$4 sm:$0xff]   ;;  %v2741_v11 = vld [vmem:[%s4051_s1 + $0x144] ss:$8 sps:$4 sm:$0xff]   ;;  %v219_v13 = vunpack.c.0.s8 %v218_v9 }
   0x4   :  { %1140 = vmatprep.subr.bf16.mxu0 %v2732_v2  ;;  %v3202_v12 = vshrl.u32 %v204_v7, 7  ;;  %v2743_v14 = vld [vmem:[%s4051_s1 + $0x140] ss:$8 sps:$4 sm:$0xff]   ;;  %v2744_v15 = vld [vmem:[%s4051_s1 + $0x154] ss:$8 sps:$4 sm:$0xff]  }
   0x5   :  { %v2746_v17 = vld [vmem:[%s4051_s1 + $0x150] ss:$8 sps:$4 sm:$0xff]   ;;  %v2747_v18 = vld [vmem:[%s4051_s1 + $0x164] ss:$8 sps:$4 sm:$0xff]   ;;  %v2749_v21 = vld [vmem:[%s4051_s1 + $0x160] ss:$8 sps:$4 sm:$0xff]  }
   0x6   :  { %v3211_v16 = vsub.s32 %v219_v13, %v3202_v12  ;;  %v41_v19 = vld [vmem:[%s4050_s0] sm:$0xff]  ;;  %v2750_v22 = vld [vmem:[%s4051_s1 + $0x174] ss:$8 sps:$4 sm:$0xff]   ;;  %v2752_v25 = vld [vmem:[%s4051_s1 + $0x170] ss:$8 sps:$4 sm:$0xff]  }
   0x7   :  { %1141 = vmatpush1.bf16.msra.mxu0 %v2734_v3  ;;  %v2753_v26 = vld [vmem:[%s4051_s1 + $0x184] ss:$8 sps:$4 sm:$0xff]   ;;  %v2755_v28 = vld [vmem:[%s4051_s1 + $0x180] ss:$8 sps:$4 sm:$0xff]   ;;  %v2756_v29 = vld [vmem:[%s4051_s1 + $0x194] ss:$8 sps:$4 sm:$0xff]   ;;  %v216_v39 = vcombine.high %v41_v19, %v41_v19 }
   0x8   :  { %1142 = vmatprep.subr.bf16.mxu0 %v2735_v4  ;;  %v223_v20 = vrot.slane %v41_v19, %v3211_v16  ;;  %v2758_v30 = vld [vmem:[%s4051_s1 + $0x190] ss:$8 sps:$4 sm:$0xff]   ;;  %v2759_v31 = vld [vmem:[%s4051_s1 + $0x1a4] ss:$8 sps:$4 sm:$0xff]   ;;  %v2761_v32 = vld [vmem:[%s4051_s1 + $0x1a0] ss:$8 sps:$4 sm:$0xff]  }
   0x9   :  { %v2762_v33 = vld [vmem:[%s4051_s1 + $0x1b4] ss:$8 sps:$4 sm:$0xff]   ;;  %v2764_v34 = vld [vmem:[%s4051_s1 + $0x1b0] ss:$8 sps:$4 sm:$0xff]   ;;  %v2765_v35 = vld [vmem:[%s4051_s1 + $0x1c4] ss:$8 sps:$4 sm:$0xff]   ;;  %v3276_v42 = vrot.slane %v216_v39, %v3211_v16 }
   0xa   :  { %v231_v23 = vcombine.high %v223_v20, %v223_v20  ;;  %v2767_v36 = vld [vmem:[%s4051_s1 + $0x1c0] ss:$8 sps:$4 sm:$0xff]   ;;  %v2768_v37 = vld [vmem:[%s4051_s1 + $0x1d4] ss:$8 sps:$4 sm:$0xff]   ;;  %v2770_v38 = vld [vmem:[%s4051_s1 + $0x1d0] ss:$8 sps:$4 sm:$0xff]   ;;  %v3282_v44 = vrot.slane %v223_v20, %v3211_v16 }
   0xb   :  { %1143 = vmatpush1.bf16.msra.mxu0 %v2737_v5  ;;  %v2771_v40 = vld [vmem:[%s4051_s1 + $0x1e4] ss:$8 sps:$4 sm:$0xff]   ;;  %v2773_v41 = vld [vmem:[%s4051_s1 + $0x1e0] ss:$8 sps:$4 sm:$0xff]   ;;  %v2774_v43 = vld [vmem:[%s4051_s1 + $0x1f4] ss:$8 sps:$4 sm:$0xff]   ;;  %v232_v46 = vcombine.high %v3276_v42, %v3276_v42 }
   0xc   :  { %1144 = vmatprep.subr.bf16.mxu0 %v2738_v6  ;;  %v253_v24 = vrot.slane %v231_v23, %v3211_v16  ;;  %v2776_v45 = vld [vmem:[%s4051_s1 + $0x1f0] ss:$8 sps:$4 sm:$0xff]   ;;  %v2780_v47 = vld [vmem:[%s4051_s1 + $0x204] ss:$8 sps:$4 sm:$0xff]   ;;  %v2778_v48 = vld [vmem:[%s4051_s1 + $0x200] ss:$8 sps:$4 sm:$0xff]   ;;  %v261_v49 = vcombine.high %v3282_v44, %v3282_v44 }
   0xd   :  { %v2783_v50 = vld [vmem:[%s4051_s1 + $0x214] ss:$8 sps:$4 sm:$0xff]   ;;  %v3301_v51 = vrot.slane %v232_v46, %v3211_v16  ;;  %v2871_v52 = vld [vmem:[%s4051_s1 + $0x4] ss:$8 sps:$4 sm:$0xff]   ;;  %v2873_v53 = vld [vmem:[%s4051_s1] ss:$8 sps:$4 sm:$0xff]  }
   0xe   :  { %v263_v27 = vcombine.high %v253_v24, %v253_v24  ;;  %1129 = vmatprep.mubr.bf16.mxu1 %v253_v24  ;;  %1097 = vmatprep.subr.bf16.mxu1 %v2871_v52  ;;  %v2877_v54 = vld [vmem:[%s4051_s1 + $0x14] ss:$8 sps:$4 sm:$0xff]   ;;  %v2879_v55 = vld [vmem:[%s4051_s1 + $0x10] ss:$8 sps:$4 sm:$0xff]   ;;  %v2786_v57 = vld [vmem:[%s4051_s1 + $0x224] ss:$8 sps:$4 sm:$0xff]  }
   0xf   :  { %1145 = vmatpush1.bf16.msra.mxu0 %v2740_v10  ;;  %1098 = vmatpush1.bf16.msra.mxu1 %v2873_v53  ;;  %v2781_v56 = vld [vmem:[%s4051_s1 + $0x210] ss:$8 sps:$4 sm:$0xff]   ;;  %v2883_v58 = vld [vmem:[%s4051_s1 + $0x24] ss:$8 sps:$4 sm:$0xff]   ;;  %v2784_v59 = vld [vmem:[%s4051_s1 + $0x220] ss:$8 sps:$4 sm:$0xff]  }
  0x10   :  { %1146 = vmatprep.subr.bf16.mxu0 %v2741_v11  ;;  %1170 = vmatprep.mubr.bf16.mxu0 %v263_v27  ;;  %v2885_v60 = vld [vmem:[%s4051_s1 + $0x20] ss:$8 sps:$4 sm:$0xff]   ;;  %v2889_v61 = vld [vmem:[%s4051_s1 + $0x34] ss:$8 sps:$4 sm:$0xff]   ;;  %v2891_v63 = vld [vmem:[%s4051_s1 + $0x30] ss:$8 sps:$4 sm:$0xff]  }
  0x11   :  { %1099 = vmatprep.subr.bf16.mxu1 %v2877_v54  ;;  %v2789_v62 = vld [vmem:[%s4051_s1 + $0x234] ss:$8 sps:$4 sm:$0xff]   ;;  %v2787_v0 = vld [vmem:[%s4051_s1 + $0x230] ss:$8 sps:$4 sm:$0xff]   ;;  %v2792_v1 = vld [vmem:[%s4051_s1 + $0x244] ss:$8 sps:$4 sm:$0xff]  }
  0x12   :  { %v2895_v2 = vld [vmem:[%s4051_s1 + $0x44] ss:$8 sps:$4 sm:$0xff]   ;;  %v2897_v3 = vld [vmem:[%s4051_s1 + $0x40] ss:$8 sps:$4 sm:$0xff]   ;;  %v2795_v5 = vld [vmem:[%s4051_s1 + $0x254] ss:$8 sps:$4 sm:$0xff]  }
  0x13   :  { %1147 = vmatpush1.bf16.msra.mxu0 %v2743_v14  ;;  %1100 = vmatpush1.bf16.msra.mxu1 %v2879_v55  ;;  %v2790_v4 = vld [vmem:[%s4051_s1 + $0x240] ss:$8 sps:$4 sm:$0xff]   ;;  %v2901_v6 = vld [vmem:[%s4051_s1 + $0x54] ss:$8 sps:$4 sm:$0xff]   ;;  %v2903_v7 = vld [vmem:[%s4051_s1 + $0x50] ss:$8 sps:$4 sm:$0xff]  }
  0x14   :  { %1148 = vmatprep.subr.bf16.mxu0 %v2744_v15  ;;  %1101 = vmatprep.subr.bf16.mxu1 %v2883_v58  ;;  %v2793_v8 = vld [vmem:[%s4051_s1 + $0x250] ss:$8 sps:$4 sm:$0xff]   ;;  %v2798_v9 = vld [vmem:[%s4051_s1 + $0x264] ss:$8 sps:$4 sm:$0xff]   ;;  %v2909_v11 = vld [vmem:[%s4051_s1 + $0x60] ss:$8 sps:$4 sm:$0xff]   ;;  %v264_v58 = vcombine.high %v3301_v51, %v3301_v51 }
  0x15   :  { %v2907_v10 = vld [vmem:[%s4051_s1 + $0x64] ss:$8 sps:$4 sm:$0xff]   ;;  %v2796_v13 = vld [vmem:[%s4051_s1 + $0x260] ss:$8 sps:$4 sm:$0xff]   ;;  %v2801_v14 = vld [vmem:[%s4051_s1 + $0x274] ss:$8 sps:$4 sm:$0xff]  }
  0x16   :  { %v2913_v15 = vld [vmem:[%s4051_s1 + $0x74] ss:$8 sps:$4 sm:$0xff]   ;;  %v2804_v19 = vld [vmem:[%s4051_s1 + $0x284] ss:$8 sps:$4 sm:$0xff]   ;;  %v2963_v52 = vld [vmem:[%s4051_s1 + $0xf0] ss:$8 sps:$4 sm:$0xff]  }
  0x17   :  { %1149 = vmatpush1.bf16.msra.mxu0 %v2746_v17  ;;  %1102 = vmatpush1.bf16.msra.mxu1 %v2885_v60  ;;  %v2915_v17 = vld [vmem:[%s4051_s1 + $0x70] ss:$8 sps:$4 sm:$0xff]   ;;  %v2919_v20 = vld [vmem:[%s4051_s1 + $0x84] ss:$8 sps:$4 sm:$0xff]   ;;  %v2807_v23 = vld [vmem:[%s4051_s1 + $0x294] ss:$8 sps:$4 sm:$0xff]  }
  0x18   :  { %1150 = vmatprep.subr.bf16.mxu0 %v2747_v18  ;;  %1103 = vmatprep.subr.bf16.mxu1 %v2889_v61  ;;  %v2799_v18 = vld [vmem:[%s4051_s1 + $0x270] ss:$8 sps:$4 sm:$0xff]   ;;  %v2925_v24 = vld [vmem:[%s4051_s1 + $0x94] ss:$8 sps:$4 sm:$0xff]   ;;  %v2810_v27 = vld [vmem:[%s4051_s1 + $0x2a4] ss:$8 sps:$4 sm:$0xff]  }
  0x19   :  { %v2819_v39 = vld [vmem:[%s4051_s1 + $0x2d4] ss:$8 sps:$4 sm:$0xff]   ;;  %v2955_v46 = vld [vmem:[%s4051_s1 + $0xe4] ss:$8 sps:$4 sm:$0xff]   ;;  %v2823_v53 = vld [vmem:[%s4051_s1 + $0x2f0] ss:$8 sps:$4 sm:$0xff]  }
  0x1a   :  { %v2828_v54 = vld [vmem:[%s4051_s1 + $0x304] ss:$8 sps:$4 sm:$0xff]   ;;  %v2826_v55 = vld [vmem:[%s4051_s1 + $0x300] ss:$8 sps:$4 sm:$0xff]   ;;  %v2829_v60 = vld [vmem:[%s4051_s1 + $0x310] ss:$8 sps:$4 sm:$0xff]  }
  0x1b   :  { %1151 = vmatpush1.bf16.msra.mxu0 %v2749_v21  ;;  %1104 = vmatpush1.bf16.msra.mxu1 %v2891_v63  ;;  %v2921_v21 = vld [vmem:[%s4051_s1 + $0x80] ss:$8 sps:$4 sm:$0xff]   ;;  %v2973_v61 = vld [vmem:[%s4052_s2 + $0x10] ss:$8 sps:$4 sm:$0xff]  }
  0x1c   :  { %1152 = vmatprep.subr.bf16.mxu0 %v2750_v22  ;;  %1105 = vmatprep.subr.bf16.mxu1 %v2895_v2  ;;  %v2802_v22 = vld [vmem:[%s4051_s1 + $0x280] ss:$8 sps:$4 sm:$0xff]   ;;  %v2835_v2 = vld [vmem:[%s4051_s1 + $0x330] ss:$8 sps:$4 sm:$0xff]  }
  0x1d   :  { %v2832_v63 = vld [vmem:[%s4051_s1 + $0x320] ss:$8 sps:$4 sm:$0xff]  }
  0x1f   :  { %1153 = vmatpush1.bf16.msra.mxu0 %v2752_v25  ;;  %1106 = vmatpush1.bf16.msra.mxu1 %v2897_v3  ;;  %v2927_v25 = vld [vmem:[%s4051_s1 + $0x90] ss:$8 sps:$4 sm:$0xff]   ;;  %v2981_v3 = vld [vmem:[%s4052_s2 + $0x34] ss:$8 sps:$4 sm:$0xff]  }
  0x20   :  { %1154 = vmatprep.subr.bf16.mxu0 %v2753_v26  ;;  %1107 = vmatprep.subr.bf16.mxu1 %v2901_v6  ;;  %v2805_v26 = vld [vmem:[%s4051_s1 + $0x290] ss:$8 sps:$4 sm:$0xff]   ;;  %v2984_v6 = vld [vmem:[%s4052_s2 + $0x44] ss:$8 sps:$4 sm:$0xff]  }
  0x23   :  { %1155 = vmatpush1.bf16.msra.mxu0 %v2755_v28  ;;  %1108 = vmatpush1.bf16.msra.mxu1 %v2903_v7  ;;  %v2931_v28 = vld [vmem:[%s4051_s1 + $0xa4] ss:$8 sps:$4 sm:$0xff]   ;;  %v2838_v7 = vld [vmem:[%s4051_s1 + $0x340] ss:$8 sps:$4 sm:$0xff]  }
  0x24   :  { %1156 = vmatprep.subr.bf16.mxu0 %v2756_v29  ;;  %1109 = vmatprep.subr.bf16.mxu1 %v2907_v10  ;;  %v2933_v29 = vld [vmem:[%s4051_s1 + $0xa0] ss:$8 sps:$4 sm:$0xff]   ;;  %v2987_v10 = vld [vmem:[%s4052_s2 + $0x54] ss:$8 sps:$4 sm:$0xff]  }
  0x27   :  { %1157 = vmatpush1.bf16.msra.mxu0 %v2758_v30  ;;  %1110 = vmatpush1.bf16.msra.mxu1 %v2909_v11  ;;  %v2808_v30 = vld [vmem:[%s4051_s1 + $0x2a0] ss:$8 sps:$4 sm:$0xff]   ;;  %v2841_v11 = vld [vmem:[%s4051_s1 + $0x350] ss:$8 sps:$4 sm:$0xff]  }
  0x28   :  { %1158 = vmatprep.subr.bf16.mxu0 %v2759_v31  ;;  %1111 = vmatprep.subr.bf16.mxu1 %v2913_v15  ;;  %v2813_v31 = vld [vmem:[%s4051_s1 + $0x2b4] ss:$8 sps:$4 sm:$0xff]   ;;  %v2990_v15 = vld [vmem:[%s4052_s2 + $0x64] ss:$8 sps:$4 sm:$0xff]  }
  0x2b   :  { %1159 = vmatpush1.bf16.msra.mxu0 %v2761_v32  ;;  %1112 = vmatpush1.bf16.msra.mxu1 %v2915_v17  ;;  %v2937_v32 = vld [vmem:[%s4051_s1 + $0xb4] ss:$8 sps:$4 sm:$0xff]   ;;  %v2844_v17 = vld [vmem:[%s4051_s1 + $0x360] ss:$8 sps:$4 sm:$0xff]  }
  0x2c   :  { %1160 = vmatprep.subr.bf16.mxu0 %v2762_v33  ;;  %1113 = vmatprep.subr.bf16.mxu1 %v2919_v20  ;;  %v2939_v33 = vld [vmem:[%s4051_s1 + $0xb0] ss:$8 sps:$4 sm:$0xff]  }
  0x2f   :  { %1161 = vmatpush1.bf16.msra.mxu0 %v2764_v34  ;;  %1114 = vmatpush1.bf16.msra.mxu1 %v2921_v21  ;;  %v2811_v34 = vld [vmem:[%s4051_s1 + $0x2b0] ss:$8 sps:$4 sm:$0xff]  }
  0x30   :  { %1162 = vmatprep.subr.bf16.mxu0 %v2765_v35  ;;  %1115 = vmatprep.subr.bf16.mxu1 %v2925_v24  ;;  %v2816_v35 = vld [vmem:[%s4051_s1 + $0x2c4] ss:$8 sps:$4 sm:$0xff]  }
  0x33   :  { %1163 = vmatpush1.bf16.msra.mxu0 %v2767_v36  ;;  %1116 = vmatpush1.bf16.msra.mxu1 %v2927_v25  ;;  %v2943_v36 = vld [vmem:[%s4051_s1 + $0xc4] ss:$8 sps:$4 sm:$0xff]  }
  0x34   :  { %1164 = vmatprep.subr.bf16.mxu0 %v2768_v37  ;;  %1117 = vmatprep.subr.bf16.mxu1 %v2931_v28  ;;  %v2945_v37 = vld [vmem:[%s4051_s1 + $0xc0] ss:$8 sps:$4 sm:$0xff]  }
  0x37   :  { %1165 = vmatpush1.bf16.msra.mxu0 %v2770_v38  ;;  %1118 = vmatpush1.bf16.msra.mxu1 %v2933_v29  ;;  %v2814_v38 = vld [vmem:[%s4051_s1 + $0x2c0] ss:$8 sps:$4 sm:$0xff]  }
  0x38   :  { %1166 = vmatprep.subr.bf16.mxu0 %v2771_v40  ;;  %1119 = vmatprep.subr.bf16.mxu1 %v2937_v32  ;;  %v2949_v40 = vld [vmem:[%s4051_s1 + $0xd4] ss:$8 sps:$4 sm:$0xff]  }
  0x3b   :  { %1167 = vmatpush1.bf16.msra.mxu0 %v2773_v41  ;;  %1120 = vmatpush1.bf16.msra.mxu1 %v2939_v33  ;;  %v2951_v41 = vld [vmem:[%s4051_s1 + $0xd0] ss:$8 sps:$4 sm:$0xff]  }
  0x3c   :  { %1168 = vmatprep.subr.bf16.mxu0 %v2774_v43  ;;  %1121 = vmatprep.subr.bf16.mxu1 %v2943_v36  ;;  %v2817_v43 = vld [vmem:[%s4051_s1 + $0x2d0] ss:$8 sps:$4 sm:$0xff]  }
  0x3f   :  { %1169 = vmatpush1.bf16.msra.mxu0 %v2776_v45  ;;  %1122 = vmatpush1.bf16.msra.mxu1 %v2945_v37  ;;  %v2822_v45 = vld [vmem:[%s4051_s1 + $0x2e4] ss:$8 sps:$4 sm:$0xff]  }
  0x40   :  { %1179 = vmatprep.subr.bf16.mxu0 %v2780_v47  ;;  %1123 = vmatprep.subr.bf16.mxu1 %v2949_v40  ;;  %v2957_v47 = vld [vmem:[%s4051_s1 + $0xe0] ss:$8 sps:$4 sm:$0xff]  }
  0x42   :  { %1171 = vmatmul.mubr.bf16.vlgmr.msra.gmra.mrb[0].mxu0 %v261_v49  ;;  %v2825_v49 = vld [vmem:[%s4051_s1 + $0x2f4] ss:$8 sps:$4 sm:$0xff]  }
  0x43   :  { %1180 = vmatpush1.bf16.msra.mxu0 %v2778_v48  ;;  %1211 = vmatprep.mubr.bf16.mxu0 %v3301_v51  ;;  %v2820_v48 = vld [vmem:[%s4051_s1 + $0x2e0] ss:$8 sps:$4 sm:$0xff]   ;;  %v2834_v51 = vld [vmem:[%s4051_s1 + $0x324] ss:$8 sps:$4 sm:$0xff]  }
  0x44   :  { %1181 = vmatprep.subr.bf16.mxu0 %v2783_v50  ;;  %1124 = vmatpush1.bf16.msra.mxu1 %v2951_v41  ;;  %v2961_v50 = vld [vmem:[%s4051_s1 + $0xf4] ss:$8 sps:$4 sm:$0xff]  }
  0x45   :  { %1125 = vmatprep.subr.bf16.mxu1 %v2955_v46 }
  0x47   :  { %1182 = vmatpush1.bf16.msra.mxu0 %v2781_v56  ;;  %v3495_v56 = vrot.slane %v3276_v42, %v3211_v16  ;;  %v2972_v42 = vld [vmem:[%s4052_s2 + $0x4] ss:$8 sps:$4 sm:$0xff]  }
  0x48   :  { %1183 = vmatprep.subr.bf16.mxu0 %v2786_v57  ;;  %1126 = vmatpush1.bf16.msra.mxu1 %v2957_v47  ;;  %v2831_v57 = vld [vmem:[%s4051_s1 + $0x314] ss:$8 sps:$4 sm:$0xff]  }
  0x49   :  { %1127 = vmatprep.subr.bf16.mxu1 %v2961_v50 }
  0x4b   :  { %1184 = vmatpush1.bf16.msra.mxu0 %v2784_v59  ;;  %v2970_v59 = vld [vmem:[%s4052_s2] ss:$8 sps:$4 sm:$0xff]  }
  0x4c   :  { %1185 = vmatprep.subr.bf16.mxu0 %v2789_v62  ;;  %1128 = vmatpush1.bf16.msra.mxu1 %v2963_v52  ;;  %v2978_v62 = vld [vmem:[%s4052_s2 + $0x24] ss:$8 sps:$4 sm:$0xff]  }
  0x4d   :  { %1509 = vmatprep.subr.bf16.mxu1 %v2972_v42 }
  0x4f   :  { %1186 = vmatpush1.bf16.msra.mxu0 %v2787_v0  ;;  %1130 = vmatmul.mubr.bf16.vlgmr.msra.gmra.mrb[0].mxu1 %v3282_v44  ;;  %v2975_v44 = vld [vmem:[%s4052_s2 + $0x14] ss:$8 sps:$4 sm:$0xff]  }
  0x50   :  { %1187 = vmatprep.subr.bf16.mxu0 %v2792_v1  ;;  %1510 = vmatpush1.bf16.msra.mxu1 %v2970_v59  ;;  %v2837_v0 = vld [vmem:[%s4051_s1 + $0x334] ss:$8 sps:$4 sm:$0xff]   ;;  %v2976_v1 = vld [vmem:[%s4052_s2 + $0x20] ss:$8 sps:$4 sm:$0xff]  }
  0x51   :  { %1511 = vmatprep.subr.bf16.mxu1 %v2975_v44 }
  0x53   :  { %1188 = vmatpush1.bf16.msra.mxu0 %v2790_v4  ;;  %v2840_v4 = vld [vmem:[%s4051_s1 + $0x344] ss:$8 sps:$4 sm:$0xff]  }
  0x54   :  { %1189 = vmatprep.subr.bf16.mxu0 %v2795_v5  ;;  %1512 = vmatpush1.bf16.msra.mxu1 %v2973_v61  ;;  %v2979_v5 = vld [vmem:[%s4052_s2 + $0x30] ss:$8 sps:$4 sm:$0xff]  }
  0x55   :  { %1513 = vmatprep.subr.bf16.mxu1 %v2978_v62 }
  0x57   :  { %1190 = vmatpush1.bf16.msra.mxu0 %v2793_v8  ;;  %v2843_v8 = vld [vmem:[%s4051_s1 + $0x354] ss:$8 sps:$4 sm:$0xff]  }
  0x58   :  { %1191 = vmatprep.subr.bf16.mxu0 %v2798_v9  ;;  %1514 = vmatpush1.bf16.msra.mxu1 %v2976_v1  ;;  %v2982_v9 = vld [vmem:[%s4052_s2 + $0x40] ss:$8 sps:$4 sm:$0xff]  }
  0x59   :  { %1515 = vmatprep.subr.bf16.mxu1 %v2981_v3 }
  0x5b   :  { %1192 = vmatpush1.bf16.msra.mxu0 %v2796_v13  ;;  %v2846_v13 = vld [vmem:[%s4051_s1 + $0x364] ss:$8 sps:$4 sm:$0xff]  }
  0x5c   :  { %1193 = vmatprep.subr.bf16.mxu0 %v2801_v14  ;;  %1516 = vmatpush1.bf16.msra.mxu1 %v2979_v5  ;;  %v2985_v14 = vld [vmem:[%s4052_s2 + $0x50] ss:$8 sps:$4 sm:$0xff]  }
  0x5d   :  { %1517 = vmatprep.subr.bf16.mxu1 %v2984_v6 }
  0x5f   :  { %1194 = vmatpush1.bf16.msra.mxu0 %v2799_v18  ;;  %v2849_v18 = vld [vmem:[%s4051_s1 + $0x374] ss:$8 sps:$4 sm:$0xff]  }
  0x60   :  { %1195 = vmatprep.subr.bf16.mxu0 %v2804_v19  ;;  %1518 = vmatpush1.bf16.msra.mxu1 %v2982_v9  ;;  %v2988_v19 = vld [vmem:[%s4052_s2 + $0x60] ss:$8 sps:$4 sm:$0xff]  }
  0x61   :  { %1519 = vmatprep.subr.bf16.mxu1 %v2987_v10 }
  0x63   :  { %1196 = vmatpush1.bf16.msra.mxu0 %v2802_v22 }
  0x64   :  { %1197 = vmatprep.subr.bf16.mxu0 %v2807_v23  ;;  %1520 = vmatpush1.bf16.msra.mxu1 %v2985_v14 }
  0x67   :  { %1198 = vmatpush1.bf16.msra.mxu0 %v2805_v26 }
  0x68   :  { %1199 = vmatprep.subr.bf16.mxu0 %v2810_v27 }
  0x6b   :  { %1200 = vmatpush1.bf16.msra.mxu0 %v2808_v30 }
  0x6c   :  { %1201 = vmatprep.subr.bf16.mxu0 %v2813_v31 }
  0x6f   :  { %1202 = vmatpush1.bf16.msra.mxu0 %v2811_v34 }
  0x70   :  { %1203 = vmatprep.subr.bf16.mxu0 %v2816_v35 }
  0x73   :  { %1204 = vmatpush1.bf16.msra.mxu0 %v2814_v38 }
  0x74   :  { %1205 = vmatprep.subr.bf16.mxu0 %v2819_v39 }
  0x77   :  { %1206 = vmatpush1.bf16.msra.mxu0 %v2817_v43 }
  0x78   :  { %1207 = vmatprep.subr.bf16.mxu0 %v2822_v45 }
  0x7b   :  { %1208 = vmatpush1.bf16.msra.mxu0 %v2820_v48 }
  0x7c   :  { %1209 = vmatprep.subr.bf16.mxu0 %v2825_v49 }
  0x7f   :  { %1210 = vmatpush1.bf16.msra.mxu0 %v2823_v53 }
  0x80   :  { %1220 = vmatprep.subr.bf16.mxu0 %v2828_v54 }
  0x82   :  { %1212 = vmatmul.mubr.bf16.vlgmr.msra.gmra.mrb[0].mxu0 %v3495_v56 }
  0x83   :  { %1221 = vmatpush1.bf16.msra.mxu0 %v2826_v55  ;;  %1252 = vmatprep.mubr.bf16.mxu0 %v264_v58 }
  0x84   :  { %1222 = vmatprep.subr.bf16.mxu0 %v2831_v57 }
  0x87   :  { %1223 = vmatpush1.bf16.msra.mxu0 %v2829_v60 }
  0x88   :  { %1224 = vmatprep.subr.bf16.mxu0 %v2834_v51 }
  0x8b   :  { %1225 = vmatpush1.bf16.msra.mxu0 %v2832_v63 }
  0x8c   :  { %1226 = vmatprep.subr.bf16.mxu0 %v2837_v0 }
  0x8f   :  { %1227 = vmatpush1.bf16.msra.mxu0 %v2835_v2 }
  0x90   :  { %1228 = vmatprep.subr.bf16.mxu0 %v2840_v4 }
  0x93   :  { %1229 = vmatpush1.bf16.msra.mxu0 %v2838_v7 }
  0x94   :  { %1230 = vmatprep.subr.bf16.mxu0 %v2843_v8 }
  0x97   :  { %1231 = vmatpush1.bf16.msra.mxu0 %v2841_v11 }
  0x98   :  { %1232 = vmatprep.subr.bf16.mxu0 %v2846_v13 }
  0x99   :  { %14 = vsyncpa [#allocation3], 0  ;;  %1521 = vmatprep.subr.bf16.mxu1 %v2990_v15  ;;  %v2993_v20 = vld [vmem:[%s4052_s2 + $0x74] ss:$8 sps:$4 sm:$0xff]   ;;  %v2847_v21 = vld [vmem:[%s4051_s1 + $0x370] ss:$8 sps:$4 sm:$0xff]   ;;  %v262_v55 = vcombine.high %v3495_v56, %v3495_v56 }
  0x9a   :  { %v2852_v22 = vld [vmem:[%s4051_s1 + $0x384] ss:$8 sps:$4 sm:$0xff]   ;;  %1522 = vmatpush1.bf16.msra.mxu1 %v2988_v19  ;;  %v2991_v23 = vld [vmem:[%s4052_s2 + $0x70] ss:$8 sps:$4 sm:$0xff]   ;;  %v2850_v25 = vld [vmem:[%s4051_s1 + $0x380] ss:$8 sps:$4 sm:$0xff]  }
  0x9b   :  { %1233 = vmatpush1.bf16.msra.mxu0 %v2844_v17  ;;  %1523 = vmatprep.subr.bf16.mxu1 %v2993_v20  ;;  %v2996_v24 = vld [vmem:[%s4052_s2 + $0x84] ss:$8 sps:$4 sm:$0xff]   ;;  %v2855_v26 = vld [vmem:[%s4051_s1 + $0x394] ss:$8 sps:$4 sm:$0xff]   ;;  %v2994_v27 = vld [vmem:[%s4052_s2 + $0x80] ss:$8 sps:$4 sm:$0xff]  }
  0x9c   :  { %1234 = vmatprep.subr.bf16.mxu0 %v2849_v18  ;;  %v2999_v28 = vld [vmem:[%s4052_s2 + $0x94] ss:$8 sps:$4 sm:$0xff]   ;;  %v2853_v29 = vld [vmem:[%s4051_s1 + $0x390] ss:$8 sps:$4 sm:$0xff]   ;;  %v2858_v30 = vld [vmem:[%s4051_s1 + $0x3a4] ss:$8 sps:$4 sm:$0xff]  }
  0x9d   :  { %v2997_v31 = vld [vmem:[%s4052_s2 + $0x90] ss:$8 sps:$4 sm:$0xff]   ;;  %v3002_v32 = vld [vmem:[%s4052_s2 + $0xa4] ss:$8 sps:$4 sm:$0xff]   ;;  %v2856_v33 = vld [vmem:[%s4051_s1 + $0x3a0] ss:$8 sps:$4 sm:$0xff]  }
  0x9e   :  { %1524 = vmatpush1.bf16.msra.mxu1 %v2991_v23  ;;  %v2861_v34 = vld [vmem:[%s4051_s1 + $0x3b4] ss:$8 sps:$4 sm:$0xff]   ;;  %v3000_v35 = vld [vmem:[%s4052_s2 + $0xa0] ss:$8 sps:$4 sm:$0xff]   ;;  %v2859_v37 = vld [vmem:[%s4051_s1 + $0x3b0] ss:$8 sps:$4 sm:$0xff]  }
  0x9f   :  { %1235 = vmatpush1.bf16.msra.mxu0 %v2847_v21  ;;  %1525 = vmatprep.subr.bf16.mxu1 %v2996_v24  ;;  %v3005_v36 = vld [vmem:[%s4052_s2 + $0xb4] ss:$8 sps:$4 sm:$0xff]   ;;  %v2864_v38 = vld [vmem:[%s4051_s1 + $0x3c4] ss:$8 sps:$4 sm:$0xff]   ;;  %v3003_v39 = vld [vmem:[%s4052_s2 + $0xb0] ss:$8 sps:$4 sm:$0xff]  }
  0xa0   :  { %1236 = vmatprep.subr.bf16.mxu0 %v2852_v22  ;;  %v3008_v40 = vld [vmem:[%s4052_s2 + $0xc4] ss:$8 sps:$4 sm:$0xff]   ;;  %v2862_v41 = vld [vmem:[%s4051_s1 + $0x3c0] ss:$8 sps:$4 sm:$0xff]   ;;  %v2867_v43 = vld [vmem:[%s4051_s1 + $0x3d4] ss:$8 sps:$4 sm:$0xff]  }
  0xa1   :  { %v3006_v45 = vld [vmem:[%s4052_s2 + $0xc0] ss:$8 sps:$4 sm:$0xff]   ;;  %v2865_v46 = vld [vmem:[%s4051_s1 + $0x3d0] ss:$8 sps:$4 sm:$0xff]   ;;  %v2870_v47 = vld [vmem:[%s4051_s1 + $0x3e4] ss:$8 sps:$4 sm:$0xff]  }
  0xa2   :  { %1526 = vmatpush1.bf16.msra.mxu1 %v2994_v27  ;;  %v2868_v48 = vld [vmem:[%s4051_s1 + $0x3e0] ss:$8 sps:$4 sm:$0xff]   ;;  %v2876_v49 = vld [vmem:[%s4051_s1 + $0x3f4] ss:$8 sps:$4 sm:$0xff]   ;;  %v2874_v52 = vld [vmem:[%s4051_s1 + $0x3f0] ss:$8 sps:$4 sm:$0xff]  }
  0xa3   :  { %1237 = vmatpush1.bf16.msra.mxu0 %v2850_v25  ;;  %1527 = vmatprep.subr.bf16.mxu1 %v2999_v28  ;;  %v3669_v50 = vld.sshfl [vmem:[%s4050_s0 + $0x8] sm:$0x11 pattern:$0x75316420]  ;;  %v2882_v54 = vld [vmem:[%s4051_s1 + $0x404] ss:$8 sps:$4 sm:$0xff]  }
  0xa4   :  { %1238 = vmatprep.subr.bf16.mxu0 %v2855_v26  ;;  %v272_v53 = vcombine.high %v3669_v50, %v3669_v50  ;;  %v2880_v57 = vld [vmem:[%s4051_s1 + $0x400] ss:$8 sps:$4 sm:$0xff]   ;;  %v2888_v59 = vld [vmem:[%s4051_s1 + $0x414] ss:$8 sps:$4 sm:$0xff]   ;;  %v2886_v42 = vld [vmem:[%s4051_s1 + $0x410] ss:$8 sps:$4 sm:$0xff]   ;;  %v279_v25 = vrot.slane %v3669_v50, %v3211_v16 }
  0xa5   :  { %v2894_v56 = vld [vmem:[%s4051_s1 + $0x424] ss:$8 sps:$4 sm:$0xff]   ;;  %v2892_v60 = vld [vmem:[%s4051_s1 + $0x420] ss:$8 sps:$4 sm:$0xff]   ;;  %v2900_v44 = vld [vmem:[%s4051_s1 + $0x434] ss:$8 sps:$4 sm:$0xff]  }
  0xa6   :  { %1528 = vmatpush1.bf16.msra.mxu1 %v2997_v31  ;;  %v286_v58 = vrot.slane %v272_v53, %v3211_v16  ;;  %v2898_v51 = vld [vmem:[%s4051_s1 + $0x430] ss:$8 sps:$4 sm:$0xff]   ;;  %v2906_v61 = vld [vmem:[%s4051_s1 + $0x444] ss:$8 sps:$4 sm:$0xff]   ;;  %v2904_v62 = vld [vmem:[%s4051_s1 + $0x440] ss:$8 sps:$4 sm:$0xff]  }
  0xa7   :  { %1239 = vmatpush1.bf16.msra.mxu0 %v2853_v29  ;;  %1529 = vmatprep.subr.bf16.mxu1 %v3002_v32  ;;  %v2912_v63 = vld [vmem:[%s4051_s1 + $0x454] ss:$8 sps:$4 sm:$0xff]   ;;  %v2910_v0 = vld [vmem:[%s4051_s1 + $0x450] ss:$8 sps:$4 sm:$0xff]   ;;  %v2918_v1 = vld [vmem:[%s4051_s1 + $0x464] ss:$8 sps:$4 sm:$0xff]  }
  0xa8   :  { %1240 = vmatprep.subr.bf16.mxu0 %v2858_v30  ;;  %v3009_v2 = vld [vmem:[%s4052_s2 + $0xd0] ss:$8 sps:$4 sm:$0xff]   ;;  %v3011_v3 = vld [vmem:[%s4052_s2 + $0xd4] ss:$8 sps:$4 sm:$0xff]   ;;  %v2916_v4 = vld [vmem:[%s4051_s1 + $0x460] ss:$8 sps:$4 sm:$0xff]  }
  0xa9   :  { %v2924_v5 = vld [vmem:[%s4051_s1 + $0x474] ss:$8 sps:$4 sm:$0xff]   ;;  %v2922_v6 = vld [vmem:[%s4051_s1 + $0x470] ss:$8 sps:$4 sm:$0xff]   ;;  %v2930_v7 = vld [vmem:[%s4051_s1 + $0x484] ss:$8 sps:$4 sm:$0xff]  }
  0xaa   :  { %1530 = vmatpush1.bf16.msra.mxu1 %v3000_v35  ;;  %v2928_v8 = vld [vmem:[%s4051_s1 + $0x480] ss:$8 sps:$4 sm:$0xff]   ;;  %v2936_v9 = vld [vmem:[%s4051_s1 + $0x494] ss:$8 sps:$4 sm:$0xff]   ;;  %v2934_v10 = vld [vmem:[%s4051_s1 + $0x490] ss:$8 sps:$4 sm:$0xff]  }
  0xab   :  { %1241 = vmatpush1.bf16.msra.mxu0 %v2856_v33  ;;  %1531 = vmatprep.subr.bf16.mxu1 %v3005_v36  ;;  %v2942_v11 = vld [vmem:[%s4051_s1 + $0x4a4] ss:$8 sps:$4 sm:$0xff]   ;;  %v2940_v13 = vld [vmem:[%s4051_s1 + $0x4a0] ss:$8 sps:$4 sm:$0xff]   ;;  %v2948_v14 = vld [vmem:[%s4051_s1 + $0x4b4] ss:$8 sps:$4 sm:$0xff]  }
  0xac   :  { %1242 = vmatprep.subr.bf16.mxu0 %v2861_v34  ;;  %v2946_v15 = vld [vmem:[%s4051_s1 + $0x4b0] ss:$8 sps:$4 sm:$0xff]   ;;  %v2954_v17 = vld [vmem:[%s4051_s1 + $0x4c4] ss:$8 sps:$4 sm:$0xff]   ;;  %v2952_v18 = vld [vmem:[%s4051_s1 + $0x4c0] ss:$8 sps:$4 sm:$0xff]  }
  0xad   :  { %v2960_v19 = vld [vmem:[%s4051_s1 + $0x4d4] ss:$8 sps:$4 sm:$0xff]   ;;  %v2958_v20 = vld [vmem:[%s4051_s1 + $0x4d0] ss:$8 sps:$4 sm:$0xff]   ;;  %v2966_v21 = vld [vmem:[%s4051_s1 + $0x4e4] ss:$8 sps:$4 sm:$0xff]  }
  0xae   :  { %1532 = vmatpush1.bf16.msra.mxu1 %v3003_v39  ;;  %v2964_v22 = vld [vmem:[%s4051_s1 + $0x4e0] ss:$8 sps:$4 sm:$0xff]   ;;  %v2969_v23 = vld [vmem:[%s4051_s1 + $0x4f4] ss:$8 sps:$4 sm:$0xff]   ;;  %v2967_v24 = vld [vmem:[%s4051_s1 + $0x4f0] ss:$8 sps:$4 sm:$0xff]  }
  0xaf   :  { %1243 = vmatpush1.bf16.msra.mxu0 %v2859_v37  ;;  %1533 = vmatprep.subr.bf16.mxu1 %v3008_v40  ;;  %v3014_v27 = vld [vmem:[%s4052_s2 + $0xe4] ss:$8 sps:$4 sm:$0xff]   ;;  %v3012_v29 = vld [vmem:[%s4052_s2 + $0xe0] ss:$8 sps:$4 sm:$0xff]   ;;  %v3017_v16 = vld [vmem:[%s4052_s2 + $0xf4] ss:$8 sps:$4 sm:$0xff]  }
  0xb0   :  { %1244 = vmatprep.subr.bf16.mxu0 %v2864_v38  ;;  %v3015_v32 = vld [vmem:[%s4052_s2 + $0xf0] ss:$8 sps:$4 sm:$0xff]   ;;  %v3020_v33 = vld [vmem:[%s4053_s3 + $0x4] ss:$8 sps:$4 sm:$0xff]   ;;  %v3799_v34 = vsub.s32 0, %v3202_v12  ;;  %v3805_v36 = vsub.s32 1, %v3202_v12 }
  0xb1   :  { %v34_v35 = vld [vmem:[%s4058_s8] ss:$8 sm:$0x3]  ;;  %vm3120_vm0 = vmmov 0   ;;  %s3121_s24 = smov 32   ;;  %vm2019_vm1 = vcmask 261120  }
  0xb2   :  { %1534 = vmatpush1.bf16.msra.mxu1 %v3006_v45  ;;  %v207_v37 = vrot.slane %v34_v35, %v3799_v34  ;;  %v211_v38 = vrot.slane %v34_v35, %v3805_v36  ;;  %v3018_v12 = vld [vmem:[%s4053_s3] ss:$8 sps:$4 sm:$0xff]   ;;  %s3122_s11 = smov 96   ;;  %vm2153_vm2 = vcmask 9216   ;;  %s3123_s15 = smov 64   ;;  %vm2172_vm3 = vcmask 1041408  }
  0xb3   :  { %1245 = vmatpush1.bf16.msra.mxu0 %v2862_v41  ;;  %1535 = vmatprep.subr.bf16.mxu1 %v3011_v3  ;;  %v3047_v3 = vld [vmem:[%s4053_s3 + $0x94] ss:$8 sps:$4 sm:$0xff]   ;;  %v3069_v35 = vld [vmem:[%s4054_s4 + $0x8] sm:$0xff]   ;;  %vm2168_vm4 = vcmask 15360   ;;  %s3124_s25 = smov [#allocation2]  }
  0xb4   :  { %1246 = vmatprep.subr.bf16.mxu0 %v2867_v43  ;;  %s2372_s26 = sshll.u32 %s3124_s25, 4  ;;  %s2373_s26 = int_to_ptr.vmem [resolvable:$true] %s2372_s26 }
  0xb5   :  { %p3099_p1 = scmp.lt.s32.totalorder %s2373_s26, %s2373_s26 }
  0xb6   :  { %1536 = vmatpush1.bf16.msra.mxu1 %v3009_v2  ;;  %v3042_v2 = vld [vmem:[%s4053_s3 + $0x80] ss:$8 sps:$4 sm:$0xff]  }
  0xb7   :  { %1247 = vmatpush1.bf16.msra.mxu0 %v2865_v46  ;;  %1537 = vmatprep.subr.bf16.mxu1 %v3014_v27 }
  0xb8   :  { %1248 = vmatprep.subr.bf16.mxu0 %v2870_v47 }
  0xba   :  { %1538 = vmatpush1.bf16.msra.mxu1 %v3012_v29 }
  0xbb   :  { %1249 = vmatpush1.bf16.msra.mxu0 %v2868_v48  ;;  %1539 = vmatprep.subr.bf16.mxu1 %v3017_v16  ;;  %v3067_v16 = vld [vmem:[%s4054_s4] sm:$0xff]  }
  0xbc   :  { %1250 = vmatprep.subr.bf16.mxu0 %v2876_v49 }
  0xbe   :  { %1540 = vmatpush1.bf16.msra.mxu1 %v3015_v32 }
  0xbf   :  { %1251 = vmatpush1.bf16.msra.mxu0 %v2874_v52  ;;  %1757 = vmatprep.subr.bf16.mxu1 %v3020_v33  ;;  %v3068_v33 = vld [vmem:[%s4054_s4 + $0x48] sm:$0xff]  }
  0xc0   :  { %1261 = vmatprep.subr.bf16.mxu0 %v2882_v54  ;;  %v3023_v54 = vld [vmem:[%s4053_s3 + $0x14] ss:$8 sps:$4 sm:$0xff]  }
  0xc2   :  { %1253 = vmatmul.mubr.bf16.vlgmr.msra.gmra.mrb[0].mxu0 %v262_v55  ;;  %v3021_v55 = vld [vmem:[%s4053_s3 + $0x10] ss:$8 sps:$4 sm:$0xff]  }
  0xc3   :  { %1262 = vmatpush1.bf16.msra.mxu0 %v2880_v57  ;;  %1293 = vmatprep.mubr.bf16.mxu0 %v286_v58  ;;  %v3026_v57 = vld [vmem:[%s4053_s3 + $0x24] ss:$8 sps:$4 sm:$0xff]   ;;  %v3024_v58 = vld [vmem:[%s4053_s3 + $0x20] ss:$8 sps:$4 sm:$0xff]  }
  0xc4   :  { %1263 = vmatprep.subr.bf16.mxu0 %v2888_v59  ;;  %v3029_v59 = vld [vmem:[%s4053_s3 + $0x34] ss:$8 sps:$4 sm:$0xff]  }
  0xc7   :  { %1264 = vmatpush1.bf16.msra.mxu0 %v2886_v42  ;;  %v3027_v42 = vld [vmem:[%s4053_s3 + $0x30] ss:$8 sps:$4 sm:$0xff]  }
  0xc8   :  { %1265 = vmatprep.subr.bf16.mxu0 %v2894_v56  ;;  %v3032_v56 = vld [vmem:[%s4053_s3 + $0x44] ss:$8 sps:$4 sm:$0xff]  }
  0xcb   :  { %1266 = vmatpush1.bf16.msra.mxu0 %v2892_v60  ;;  %v3030_v60 = vld [vmem:[%s4053_s3 + $0x40] ss:$8 sps:$4 sm:$0xff]  }
  0xcc   :  { %1267 = vmatprep.subr.bf16.mxu0 %v2900_v44  ;;  %v3035_v44 = vld [vmem:[%s4053_s3 + $0x54] ss:$8 sps:$4 sm:$0xff]  }
  0xcf   :  { %1268 = vmatpush1.bf16.msra.mxu0 %v2898_v51  ;;  %v3033_v51 = vld [vmem:[%s4053_s3 + $0x50] ss:$8 sps:$4 sm:$0xff]  }
  0xd0   :  { %1269 = vmatprep.subr.bf16.mxu0 %v2906_v61  ;;  %v3038_v61 = vld [vmem:[%s4053_s3 + $0x64] ss:$8 sps:$4 sm:$0xff]  }
  0xd3   :  { %1270 = vmatpush1.bf16.msra.mxu0 %v2904_v62  ;;  %v3036_v62 = vld [vmem:[%s4053_s3 + $0x60] ss:$8 sps:$4 sm:$0xff]  }
  0xd4   :  { %1271 = vmatprep.subr.bf16.mxu0 %v2912_v63  ;;  %v3041_v63 = vld [vmem:[%s4053_s3 + $0x74] ss:$8 sps:$4 sm:$0xff]  }
  0xd7   :  { %1272 = vmatpush1.bf16.msra.mxu0 %v2910_v0  ;;  %v3039_v0 = vld [vmem:[%s4053_s3 + $0x70] ss:$8 sps:$4 sm:$0xff]  }
  0xd8   :  { %1273 = vmatprep.subr.bf16.mxu0 %v2918_v1  ;;  %v3044_v1 = vld [vmem:[%s4053_s3 + $0x84] ss:$8 sps:$4 sm:$0xff]  }
  0xdb   :  { %1274 = vmatpush1.bf16.msra.mxu0 %v2916_v4  ;;  %v3045_v4 = vld [vmem:[%s4053_s3 + $0x90] ss:$8 sps:$4 sm:$0xff]  }
  0xdc   :  { %1275 = vmatprep.subr.bf16.mxu0 %v2924_v5  ;;  %v3050_v5 = vld [vmem:[%s4053_s3 + $0xa4] ss:$8 sps:$4 sm:$0xff]  }
  0xdf   :  { %1276 = vmatpush1.bf16.msra.mxu0 %v2922_v6  ;;  %v3048_v6 = vld [vmem:[%s4053_s3 + $0xa0] ss:$8 sps:$4 sm:$0xff]  }
  0xe0   :  { %1277 = vmatprep.subr.bf16.mxu0 %v2930_v7  ;;  %v3053_v7 = vld [vmem:[%s4053_s3 + $0xb4] ss:$8 sps:$4 sm:$0xff]  }
  0xe3   :  { %1278 = vmatpush1.bf16.msra.mxu0 %v2928_v8  ;;  %v3051_v8 = vld [vmem:[%s4053_s3 + $0xb0] ss:$8 sps:$4 sm:$0xff]  }
  0xe4   :  { %1279 = vmatprep.subr.bf16.mxu0 %v2936_v9  ;;  %v3056_v9 = vld [vmem:[%s4053_s3 + $0xc4] ss:$8 sps:$4 sm:$0xff]  }
  0xe7   :  { %1280 = vmatpush1.bf16.msra.mxu0 %v2934_v10  ;;  %v3054_v10 = vld [vmem:[%s4053_s3 + $0xc0] ss:$8 sps:$4 sm:$0xff]  }
  0xe8   :  { %1281 = vmatprep.subr.bf16.mxu0 %v2942_v11  ;;  %v3059_v11 = vld [vmem:[%s4053_s3 + $0xd4] ss:$8 sps:$4 sm:$0xff]  }
  0xeb   :  { %1282 = vmatpush1.bf16.msra.mxu0 %v2940_v13  ;;  %v3057_v13 = vld [vmem:[%s4053_s3 + $0xd0] ss:$8 sps:$4 sm:$0xff]  }
  0xec   :  { %1283 = vmatprep.subr.bf16.mxu0 %v2948_v14  ;;  %v3062_v14 = vld [vmem:[%s4053_s3 + $0xe4] ss:$8 sps:$4 sm:$0xff]  }
  0xef   :  { %1284 = vmatpush1.bf16.msra.mxu0 %v2946_v15  ;;  %v3060_v15 = vld [vmem:[%s4053_s3 + $0xe0] ss:$8 sps:$4 sm:$0xff]  }
  0xf0   :  { %1285 = vmatprep.subr.bf16.mxu0 %v2954_v17  ;;  %v3065_v17 = vld [vmem:[%s4053_s3 + $0xf4] ss:$8 sps:$4 sm:$0xff]  }
  0xf3   :  { %1286 = vmatpush1.bf16.msra.mxu0 %v2952_v18  ;;  %v3063_v18 = vld [vmem:[%s4053_s3 + $0xf0] ss:$8 sps:$4 sm:$0xff]  }
  0xf4   :  { %1287 = vmatprep.subr.bf16.mxu0 %v2960_v19  ;;  %v3066_v19 = vld [vmem:[%s4054_s4 + $0x40] sm:$0xff]  }
  0xf7   :  { %1288 = vmatpush1.bf16.msra.mxu0 %v2958_v20  ;;  %v2380_v20 = vld [vmem:[%s4058_s8 + $0x1] ss:$8 sm:$0x3] }
  0xf8   :  { %1289 = vmatprep.subr.bf16.mxu0 %v2966_v21  ;;  %v1342_v21 = vrot.slane %v2380_v20, %v3799_v34 }
  0xfb   :  { %1290 = vmatpush1.bf16.msra.mxu0 %v2964_v22  ;;  %v1346_v22 = vrot.slane %v2380_v20, %v3805_v36 }
  0xfc   :  { %1291 = vmatprep.subr.bf16.mxu0 %v2969_v23 }
  0xff   :  { %1292 = vmatpush1.bf16.msra.mxu0 %v2967_v24 }
 0x102   :  { %1294 = vmatmul.mubr.bf16.vlgmr.msra.gmra.mrb[0].mxu0 %v279_v25 }
 0x122   :  { %v1131_v26 = vpop.f32.mrb[0].mxu1 }
 0x123   :  { %v1133_v28 = vpop.f32.mrb[1].mxu1  ;;  %v1132_v39 = vadd.f32 %v1131_v26, %v207_v37  ;;  %v3070_v37 = vld [vmem:[%s4054_s4 + $0x50] sm:$0xff]  }
 0x124   :  { %v1135_v30 = vpop.f32.mrb[2].mxu1  ;;  %v1134_v40 = vadd.f32 %v1133_v28, %v211_v38  ;;  %v3071_v38 = vld [vmem:[%s4054_s4 + $0x10] sm:$0xff]  }
 0x125   :  { %v1136_v31 = vpop.f32.mrb[3].mxu1 }
 0x1d5   :  { %v1295_v41 = vpop.f32.mrb[0].mxu0 }
 0x1d6   :  { %v2707_v43 = vadd.f32 %v1295_v41, %v1132_v39  ;;  %v1297_v45 = vpop.f32.mrb[1].mxu0  ;;  %v3072_v39 = vld [vmem:[%s4054_s4 + $0x58] sm:$0xff]   ;;  %v3074_v41 = vld [vmem:[%s4054_s4 + $0x60] sm:$0xff]  }
 0x1d7   :  { %v2709_v46 = vadd.f32 %v1297_v45, %v1134_v40  ;;  %v1299_v47 = vpop.f32.mrb[2].mxu0  ;;  %v3073_v40 = vld [vmem:[%s4054_s4 + $0x18] sm:$0xff]   ;;  %v3076_v45 = vld [vmem:[%s4054_s4 + $0x68] sm:$0xff]  }
 0x1d8   :  { %v1302_v48 = vmax.f32 %v2707_v43, 0.0  ;;  %v1300_v49 = vpop.f32.mrb[3].mxu0  ;;  %v3075_v43 = vld [vmem:[%s4054_s4 + $0x20] sm:$0xff]   ;;  %v3078_v47 = vld [vmem:[%s4054_s4 + $0x70] sm:$0xff]  }
 0x1d9   :  { %v1303_v50 = vmax.f32 %v2709_v46, 0.0  ;;  %v3077_v46 = vld [vmem:[%s4054_s4 + $0x28] sm:$0xff]   ;;  %v3080_v49 = vld [vmem:[%s4054_s4 + $0x78] sm:$0xff]  }
 0x1da   :  { %v1304_v53 = vpack.c.bf16 %v1302_v48, %v1302_v48  ;;  %v3079_v48 = vld [vmem:[%s4054_s4 + $0x30] sm:$0xff]  }
 0x1db   :  { %v1305_v52 = vpack.c.bf16 %v1303_v50, %v1303_v50  ;;  %v3081_v50 = vld [vmem:[%s4054_s4 + $0x38] sm:$0xff]  }
 0x1dd   :  { %1541 = vmatprep.mubr.bf16.mxu1 %v1305_v52  ;;  %v2381_v52 = vld [vmem:[%s4058_s8 + $0x2] ss:$8 sm:$0x3] }
 0x1de   :  { %1542 = vmatmul.mubr.bf16.vlgmr.msra.gmra.mrb[4].mxu1 %v1304_v53  ;;  %v1594_v53 = vrot.slane %v2381_v52, %v3805_v36 }
 0x1df   :  { %1758 = vmatpush1.bf16.msra.mxu1 %v3018_v12  ;;  %v1590_v12 = vrot.slane %v2381_v52, %v3799_v34 }
 0x1e0   :  { %1759 = vmatprep.subr.bf16.mxu1 %v3023_v54  ;;  %v2382_v54 = vld [vmem:[%s4058_s8 + $0x3] ss:$8 sm:$0x3] }
 0x1e3   :  { %1760 = vmatpush1.bf16.msra.mxu1 %v3021_v55 }
 0x1e4   :  { %1761 = vmatprep.subr.bf16.mxu1 %v3026_v57 }
 0x1e7   :  { %1762 = vmatpush1.bf16.msra.mxu1 %v3024_v58 }
 0x1e8   :  { %1763 = vmatprep.subr.bf16.mxu1 %v3029_v59 }
 0x1eb   :  { %1764 = vmatpush1.bf16.msra.mxu1 %v3027_v42 }
 0x1ec   :  { %1765 = vmatprep.subr.bf16.mxu1 %v3032_v56 }
 0x1ef   :  { %1766 = vmatpush1.bf16.msra.mxu1 %v3030_v60  ;;  %v1806_v60 = vrot.slane %v2382_v54, %v3799_v34  ;;  %v3083_v34 = vld [vmem:[%s4055_s5 + $0x8] sm:$0xff]  }
 0x1f0   :  { %1767 = vmatprep.subr.bf16.mxu1 %v3035_v44 }
 0x1f3   :  { %1768 = vmatpush1.bf16.msra.mxu1 %v3033_v51 }
 0x1f4   :  { %1769 = vmatprep.subr.bf16.mxu1 %v3038_v61  ;;  %v1810_v61 = vrot.slane %v2382_v54, %v3805_v36  ;;  %v1821_v36 = vld [vmem:[%s4058_s8 + $0x12] ss:$0 sm:$0xff]  ;;  %v3084_v54 = vld [vmem:[%s4056_s6] sm:$0xff]  }
 0x1f5   :  { %2065 = vrot.lane.b32.xlu0 %v1821_v36, %s3121_s24 }
 0x1f7   :  { %1770 = vmatpush1.bf16.msra.mxu1 %v3036_v62 }
 0x1f8   :  { %1771 = vmatprep.subr.bf16.mxu1 %v3041_v63 }
 0x1fb   :  { %1772 = vmatpush1.bf16.msra.mxu1 %v3039_v0 }
 0x1fc   :  { %1773 = vmatprep.subr.bf16.mxu1 %v3044_v1 }
 0x1ff   :  { %1774 = vmatpush1.bf16.msra.mxu1 %v3042_v2 }
 0x200   :  { %1775 = vmatprep.subr.bf16.mxu1 %v3047_v3 }
 0x203   :  { %1776 = vmatpush1.bf16.msra.mxu1 %v3045_v4  ;;  %v3082_v4 = vld [vmem:[%s4055_s5] sm:$0xff]  }
 0x204   :  { %1777 = vmatprep.subr.bf16.mxu1 %v3050_v5  ;;  %v3119_v5 = vmov 0.0  }
 0x207   :  { %1778 = vmatpush1.bf16.msra.mxu1 %v3048_v6  ;;  %v1819_v6 = vld [vmem:[%s4058_s8 + $0x10] ss:$0 sm:$0xff] }
 0x208   :  { %1779 = vmatprep.subr.bf16.mxu1 %v3053_v7  ;;  %v1997_v7 = vadd.f32 1e-05, %v1819_v6 }
 0x20a   :  { %3088 = vrsqrt.f32 %v1997_v7 }
 0x20b   :  { %1780 = vmatpush1.bf16.msra.mxu1 %v3051_v8 }
 0x20c   :  { %1781 = vmatprep.subr.bf16.mxu1 %v3056_v9  ;;  %v1815_v9 = vld [vmem:[%s4058_s8 + $0x4] ss:$0 sm:$0xff] }
 0x20f   :  { %1782 = vmatpush1.bf16.msra.mxu1 %v3054_v10 }
 0x210   :  { %1783 = vmatprep.subr.bf16.mxu1 %v3059_v11 }
 0x213   :  { %1784 = vmatpush1.bf16.msra.mxu1 %v3057_v13 }
 0x214   :  { %1785 = vmatprep.subr.bf16.mxu1 %v3062_v14 }
 0x217   :  { %1786 = vmatpush1.bf16.msra.mxu1 %v3060_v15 }
 0x218   :  { %1787 = vmatprep.subr.bf16.mxu1 %v3065_v17  ;;  %v1818_v17 = vld [vmem:[%s4058_s8 + $0x7] ss:$0 sm:$0xff] }
 0x21b   :  { %1788 = vmatpush1.bf16.msra.mxu1 %v3063_v18 }
 0x21c   :  { %2637 = vmatprep.subr.bf16.mxu1 %v3066_v19  ;;  %v3089_v19 = vpop.eup %3088 }
 0x2b1   :  { %v1543_v23 = vpop.f32.mrb[4].mxu1 }
 0x2b2   :  { %v1544_v24 = vadd.f32 %v1543_v23, %v1342_v21  ;;  %v1545_v25 = vpop.f32.mrb[5].mxu1  ;;  %v1816_v21 = vld [vmem:[%s4058_s8 + $0x5] ss:$0 sm:$0xff]  ;;  %v1817_v23 = vld [vmem:[%s4058_s8 + $0x6] ss:$0 sm:$0xff] }
 0x2b3   :  { %v1546_v26 = vadd.f32 %v1545_v25, %v1346_v22  ;;  %v1547_v27 = vpop.f32.mrb[6].mxu1 }
 0x2b4   :  { %v1550_v28 = vmax.f32 %v1544_v24, 0.0  ;;  %v1548_v29 = vpop.f32.mrb[7].mxu1  ;;  %v2066_v27 = vpop.permute.xlu0 %2065 }
 0x2b5   :  { %v1551_v30 = vmax.f32 %v1546_v26, 0.0 }
 0x2b6   :  { %v1552_v32 = vpack.c.bf16 %v1550_v28, %v1550_v28 }
 0x2b7   :  { %v1553_v31 = vpack.c.bf16 %v1551_v30, %v1551_v30 }
 0x2b9   :  { %1789 = vmatprep.mubr.bf16.mxu1 %v1553_v31 }
 0x2ba   :  { %1790 = vmatmul.mubr.bf16.vlgmr.msra.gmra.mrb[8].mxu1 %v1552_v32  ;;  %v1820_v32 = vld [vmem:[%s4058_s8 + $0x11] ss:$0 sm:$0xff] }
 0x2bb   :  { %2638 = vmatpush3.bf16.msra.mxu1 %v3067_v16 }
 0x2bc   :  { %2639 = vmatprep.subr.bf16.mxu1 %v3068_v33 }
 0x2bf   :  { %2640 = vmatpush3.bf16.msra.mxu1 %v3069_v35 }
 0x2c0   :  { %2641 = vmatprep.subr.bf16.mxu1 %v3070_v37 }
 0x2c3   :  { %2642 = vmatpush3.bf16.msra.mxu1 %v3071_v38 }
 0x2c4   :  { %2643 = vmatprep.subr.bf16.mxu1 %v3072_v39 }
 0x2c7   :  { %2644 = vmatpush3.bf16.msra.mxu1 %v3073_v40 }
 0x2c8   :  { %2645 = vmatprep.subr.bf16.mxu1 %v3074_v41  ;;  %v1822_v41 = vld [vmem:[%s4058_s8 + $0x13] ss:$0 sm:$0xff] }
 0x2cb   :  { %2646 = vmatpush3.bf16.msra.mxu1 %v3075_v43 }
 0x2cc   :  { %2647 = vmatprep.subr.bf16.mxu1 %v3076_v45 }
 0x2cf   :  { %2648 = vmatpush3.bf16.msra.mxu1 %v3077_v46 }
 0x2d0   :  { %2649 = vmatprep.subr.bf16.mxu1 %v3078_v47 }
 0x2d3   :  { %2650 = vmatpush3.bf16.msra.mxu1 %v3079_v48 }
 0x2d4   :  { %2651 = vmatprep.subr.bf16.mxu1 %v3080_v49 }
 0x2d7   :  { %2652 = vmatpush3.bf16.msra.mxu1 %v3081_v50 }
 0x2d8   :  { %2672 = vmatprep.subr.bf16.mxu1 %v3119_v5 }
 0x38d   :  { %v1791_v55 = vpop.f32.mrb[8].mxu1 }
 0x38e   :  { %v1792_v57 = vadd.f32 %v1791_v55, %v1590_v12  ;;  %v1793_v58 = vpop.f32.mrb[9].mxu1 }
 0x38f   :  { %v1794_v59 = vadd.f32 %v1793_v58, %v1594_v53  ;;  %v1795_v42 = vpop.f32.mrb[10].mxu1 }
 0x390   :  { %v1798_v56 = vmax.f32 %v1792_v57, 0.0  ;;  %v1796_v44 = vpop.f32.mrb[11].mxu1  ;;  %v3085_v57 = vld [vmem:[%s4056_s6 + $0x8] sm:$0xff]  }
 0x391   :  { %v1799_v51 = vmax.f32 %v1794_v59, 0.0  ;;  %v3086_v59 = vld [vmem:[%s4057_s7] sm:$0xff]   ;;  %v1823_v44 = vld [vmem:[%s4058_s8 + $0x14] ss:$0 sm:$0xff] }
 0x392   :  { %v1800_v62 = vmul.f32 0.0625, %v1798_v56 }
 0x393   :  { %v1801_v63 = vmul.f32 0.0625, %v1799_v51 }
 0x394   :  { %v1813_v0 = vadd.f32 %v1806_v60, %v1800_v62  ;;  %v3087_v60 = vld [vmem:[%s4057_s7 + $0x8] sm:$0xff]   ;;  %s3094_s7 = scalar_lea.vmem %s2373_s26, 32 }
 0x395   :  { %v1814_v1 = vadd.f32 %v1810_v61, %v1801_v63  ;;  %p3095_p0 = scmp.ne.s32.totalorder %s2373_s26, %s3094_s7  ;;  %p3100_p2 = scmp.lt.s32.totalorder %s3094_s7, %s3094_s7 }
 0x396   :  { %v1825_v3 = vpack.c.bf16 %v1813_v0, %v1813_v0 }
 0x397   :  { %v1826_v2 = vpack.c.bf16 %v1814_v1, %v1814_v1  ;;  %p3101_p3 = por %p3100_p2, %p3099_p1 }
 0x399   :  { %1987 = vmatprep.mubr.bf16.mxu1 %v1826_v2  ;;  %v1824_v2 = vld [vmem:[%s4058_s8 + $0x15] ss:$0 sm:$0xff]  ;;  %p3102_p4 = pnand %p3101_p3, %p3095_p0 }
 0x39a   :  { %1988 = vmatmul.mubr.bf16.vlgmr.msra.gmra.mrb[12].mxu1 %v1825_v3 }
 0x39b   :  { %2673 = vmatpush3.bf16.msra.mxu1 %v3082_v4  ;;  %2676 = vmatprep.mubr.msk.bf16.mxu1 %vm3120_vm0, %v3119_v5 }
 0x39c   :  { %2674 = vmatprep.subr.bf16.mxu1 %v3119_v5 }
 0x39f   :  { %2675 = vmatpush3.bf16.msra.mxu1 %v3083_v34 }
 0x3a0   :  { %2680 = vmatprep.subr.mxu1 %v3119_v5 }
 0x46d   :  { %v2653_v8 = vpop.f32.mrb[12].mxu1 }
 0x46e   :  { %v2654_v10 = vpop.f32.mrb[13].mxu1 }
 0x46f   :  { %v2655_v11 = vadd.f32 %v2654_v10, %v2653_v8  ;;  %v2656_v13 = vpop.f32.mrb[14].mxu1 }
 0x470   :  { %v2657_v14 = vpop.f32.mrb[15].mxu1 }
 0x471   :  { %v1990_v15 = vadd.f32 %v2655_v11, %v1815_v9 }
 0x473   :  { %v1995_v18 = vmax.f32 %v1990_v15, 0.0 }
 0x475   :  { %v1996_v20 = vsub.f32 %v1995_v18, %v1818_v17 }
 0x477   :  { %v1999_v22 = vmul.f32 %v3089_v19, %v1996_v20 }
 0x479   :  { %v2000_v24 = vmul.f32 %v1999_v22, %v1816_v21 }
 0x47b   :  { %v2001_v25 = vadd.f32 %v2000_v24, %v1817_v23 }
 0x47d   :  { %v2002_v26 = vpack.c.bf16 %v2001_v25, %v2001_v25 }
 0x47f   :  { %2677 = vmatmul.mubr.msk.bf16.vlgmr.msra.gmra.mrb[16].mxu1 %vm2019_vm1, %v2002_v26 }
 0x480   :  { %2682 = vmatprep.mubr.msk.f32.mxu1 %vm3120_vm0, %v3119_v5 }
 0x552   :  { %v2057_v28 = vpop.f32.mrb[16].mxu1 }
 0x553   :  { %v2068_v29 = vadd.f32 %v2066_v27, %v2057_v28  ;;  %v2678_v30 = vpop.f32.mrb[17].mxu1  ;;  %v2063_v35 = vadd.f32 %v2057_v28, %v1820_v32 }
 0x554   :  { %v2060_v31 = vpop.f32.mrb[18].mxu1 }
 0x555   :  { %2075 = vrot.lane.b32.xlu0 %v2068_v29, %s3122_s11  ;;  %v2679_v16 = vpop.f32.mrb[19].mxu1 }
 0x5c7   :  { %v2076_v33 = vpop.permute.xlu0 %2075 }
 0x5c8   :  { %2681 = vmatpush3.xpose.msk.msra.mxu1 %vm2019_vm1, %v2076_v33 }
 0x5c9   :  { %2685 = vmatprep.subr.mxu1 %v3119_v5 }
 0x5cb   :  { %2683 = vmatmul.mubr.msk.f32.vlgmr.msra.gmra.mrb[20].mxu1 %vm2019_vm1, %v2063_v35 }
 0x5cc   :  { %2687 = vmatprep.mubr.msk.f32.mxu1 %vm3120_vm0, %v3119_v5 }
 0x69e   :  { %v2148_v37 = vpop.f32.mrb[20].mxu1 }
 0x69f   :  { %v2152_v38 = vmul.f32 0.17677669, %v2148_v37  ;;  %v2684_v39 = vpop.f32.mrb[21].mxu1 }
 0x6a1   :  { %v2154_v40 = vsel %vm2153_vm2, %v2152_v38, -inf }
 0x6a2   :  { %2155 = vmax.xlane.f32.xlu1 %v2154_v40 }
 0x6b3   :  { %2070 = vrot.lane.b32.xlu1 %v1822_v41, %s3123_s15 }
 0x72f   :  { %v2156_v43 = vpop.xlane.xlu1 %2155 }
 0x730   :  { %v2157_v45 = vsub.f32 %v2152_v38, %v2156_v43 }
 0x732   :  { %v2158_v46 = vmul.f32 1.442695, %v2157_v45 }
 0x733   :  { %v2071_v47 = vpop.permute.xlu1 %2070 }
 0x734   :  { %3090 = vpow2.f32 %v2158_v46  ;;  %v2073_v48 = vadd.f32 %v2071_v47, %v2057_v28 }
 0x736   :  { %2166 = vrot.lane.b32.xlu1 %v2073_v48, %s3123_s15 }
 0x73e   :  { %v3091_v49 = vpop.eup %3090 }
 0x73f   :  { %v2160_v50 = vsel %vm2153_vm2, %v3091_v49, 0.0 }
 0x740   :  { %2161 = vadd.xlane.f32.xlu0 %v2160_v50 }
 0x7a8   :  { %v2167_v52 = vpop.permute.xlu1 %2166 }
 0x7a9   :  { %2686 = vmatpush3.msk.msra.mxu1 %vm2172_vm3, %v2167_v52 }
 0x7aa   :  { %2690 = vmatprep.subr.bf16.mxu1 %v3119_v5 }
 0x7cd   :  { %v2162_v12 = vpop.xlane.xlu0 %2161 }
 0x7ce   :  { %3092 = vrcp.f32 %v2162_v12 }
 0x7d8   :  { %v3093_v53 = vpop.eup %3092 }
 0x7d9   :  { %v2164_v55 = vmul.f32 %v3093_v53, %v3091_v49 }
 0x7db   :  { %2688 = vmatmul.mubr.msk.f32.vlgmr.msra.gmra.mrb[22].mxu1 %vm2168_vm4, %v2164_v55 }
 0x7dc   :  { %2691 = vmatpush3.bf16.msra.mxu1 %v3084_v54  ;;  %2694 = vmatprep.mubr.msk.bf16.mxu1 %vm3120_vm0, %v3119_v5 }
 0x7dd   :  { %2692 = vmatprep.subr.bf16.mxu1 %v3119_v5 }
 0x7e0   :  { %2693 = vmatpush3.bf16.msra.mxu1 %v3085_v57 }
 0x7e1   :  { %2698 = vmatprep.subr.bf16.mxu1 %v3119_v5 }
 0x8ae   :  { %v2241_v58 = vpop.f32.mrb[22].mxu1 }
 0x8af   :  { %v2245_v42 = vpack.c.bf16 %v2241_v58, %v2241_v58  ;;  %v2689_v56 = vpop.f32.mrb[23].mxu1 }
 0x8b1   :  { %2695 = vmatmul.mubr.msk.bf16.vlgmr.msra.gmra.mrb[24].mxu1 %vm2019_vm1, %v2245_v42 }
 0x8b2   :  { %2699 = vmatpush3.bf16.msra.mxu1 %v3086_v59  ;;  %2702 = vmatprep.mubr.msk.bf16.mxu1 %vm3120_vm0, %v3119_v5 }
 0x8b3   :  { %2700 = vmatprep.subr.bf16.mxu1 %v3119_v5 }
 0x8b6   :  { %2701 = vmatpush3.bf16.msra.mxu1 %v3087_v60 }
 0x984   :  { %v2299_v51 = vpop.f32.mrb[24].mxu1 }
 0x985   :  { %v2300_v61 = vadd.f32 %v2299_v51, %v1823_v44  ;;  %v2696_v62 = vpop.f32.mrb[25].mxu1 }
 0x986   :  { %v2302_v63 = vpop.f32.mrb[26].mxu1 }
 0x987   :  { %v2305_v0 = vpack.c.bf16 %v2300_v61, %v2300_v61  ;;  %v2697_v1 = vpop.f32.mrb[27].mxu1 }
 0x989   :  { %2703 = vmatmul.mubr.msk.bf16.vlgmr.msra.gmra.mrb[28].mxu1 %vm2019_vm1, %v2305_v0 }
 0xa5c   :  { %v2359_v3 = vpop.f32.mrb[28].mxu1 }
 0xa5d   :  { %v2360_v4 = vadd.f32 %v2359_v3, %v1824_v2  ;;  %v2704_v5 = vpop.f32.mrb[29].mxu1 }
 0xa5e   :  { %v2362_v34 = vpop.f32.mrb[30].mxu1 }
 0xa5f   :  { %2365 = vst [vmem:[#allocation2] sm:$0x3] %v2360_v4  ;;  %v2705_v36 = vpop.f32.mrb[31].mxu1 }
 0xa60   :  { %3105 = shalt.err (!%p3102_p4)
}
 0xa61   :  { %s3106_s8 = scalar_lea.hbm %s4059_s9, 32 }
 0xa62   :  { %p3107_p5 = scmp.ne.s32.totalorder %s4059_s9, %s3106_s8  ;;  %p3110_p6 = scmp.lt.u32.totalorder %s3106_s8, %s4059_s9 }
 0xa64   :  { %p3112_p7 = pnand %p3110_p6, %p3107_p5 }
 0xa66   :  { %3115 = shalt.err (!%p3112_p7)
}
 0xa67   :  { %2375 = dma.vmem_to_hbm [thread:$0]  %s2373_s26, 32, %s4059_s9, [#allocation3]  }
 0xa68   :  { %3116 = dma.done.wait [#allocation3], 32  }
 0xa69   :  { %3117 = vsyncadd [#allocation3], 4294967264 }
 0xa6a   :  { %2379 = vsyncpa [#allocation3], 1 }

</bundles_post_ra>
